<compile_context>
chip_gen: v6e
topology: v6e:2x2x1
jax: 0.10.0
libtpu: 0.0.40
codegen_flags: <defaults>
</compile_context>

<pallas_src>
import math
import functools

import jax
import jax.numpy as jnp
from jax import lax
from jax.experimental import pallas as pl
from jax.experimental.pallas import tpu as pltpu


def bert_attention_kernel(x_ref, wq_ref, bq_ref, wkv_ref, bkv_ref, wo_ref, bo_ref,
                          gamma_ref, beta_ref, out_ref, kv_ref, q_ref, ctx_ref,
                          *, num_heads, head_size, heads_per_group, q_tile, kv_tile, eps):
    H = num_heads * head_size
    S = kv_ref.shape[0]
    cdt = wq_ref.dtype                       # bf16 MXU compute dtype
    scale = 1.0 / math.sqrt(head_size)

    # ---- K|V projection: computed ONCE per batch element (first q-tile step) into a
    #      persistent bf16 VMEM scratch and reused by every later query tile.
    #      (q-tile grid axis is "arbitrary", so qi == 0 always runs first per b.) ----
    @pl.when(pl.program_id(1) == 0)
    def _():
        x_full = x_ref[0]                                                # (S, H) f32
        kv = jnp.dot(x_full.astype(cdt), wkv_ref[...],
                     preferred_element_type=jnp.float32) + bkv_ref[...]
        kv_ref[...] = kv.astype(kv_ref.dtype)                            # (S, 2H) bf16

    # ---- Q projection for this query tile only ----
    q_start = pl.multiple_of(pl.program_id(1) * q_tile, q_tile)
    x_res = x_ref[0, pl.ds(q_start, q_tile), :]                          # (tq, H) f32
    q = jnp.dot(x_res.astype(cdt), wq_ref[...],
                preferred_element_type=jnp.float32) + bq_ref[...]
    q_ref[...] = q.astype(q_ref.dtype)                                   # (tq, H) bf16

    group_width = heads_per_group * head_size
    num_groups = num_heads // heads_per_group
    n_kv_tiles = S // kv_tile

    # Per-head scaled-dot-product attention with flash-style online softmax over KV
    # tiles. Heads are processed in lane-aligned groups: aligned group loads of
    # Q/K/V, cheap register slices per head, and one lane-dense group-wide ctx store.
    for g in range(num_groups):
        lo = g * group_width
        qg = q_ref[:, lo:lo + group_width]                               # aligned load
        m = [jnp.full((q_tile, 1), -jnp.inf, jnp.float32) for _ in range(heads_per_group)]
        lsum = [jnp.zeros((q_tile, 1), jnp.float32) for _ in range(heads_per_group)]
        acc = [jnp.zeros((q_tile, head_size), jnp.float32) for _ in range(heads_per_group)]

        for t in range(n_kv_tiles):
            ks = t * kv_tile
            kg = kv_ref[pl.ds(ks, kv_tile), lo:lo + group_width]         # aligned load
            vg = kv_ref[pl.ds(ks, kv_tile), H + lo:H + lo + group_width]
            for i in range(heads_per_group):
                hlo = i * head_size
                qh = qg[:, hlo:hlo + head_size]                          # (tq, dh) bf16
                kh = kg[:, hlo:hlo + head_size]                          # (kt, dh) bf16
                vh = vg[:, hlo:hlo + head_size]                          # (kt, dh) bf16
                # NT contraction over the head dim: no kh.T materialized.
                s = lax.dot_general(qh, kh, (((1,), (1,)), ((), ())),
                                    preferred_element_type=jnp.float32) * scale
                m_new = jnp.maximum(m[i], jnp.max(s, axis=-1, keepdims=True))
                alpha = jnp.exp(m[i] - m_new)
                p = jnp.exp(s - m_new)
                lsum[i] = alpha * lsum[i] + jnp.sum(p, axis=-1, keepdims=True)
                acc[i] = alpha * acc[i] + jnp.dot(p.astype(cdt), vh,
                                                  preferred_element_type=jnp.float32)
                m[i] = m_new

        # TODO(synk): attention-probs dropout skipped (eval-mode identity).
        ctx_parts = [acc[i] * pl.reciprocal(lsum[i], approx=True)
                     for i in range(heads_per_group)]
        ctx_g = ctx_parts[0] if heads_per_group == 1 else jnp.concatenate(ctx_parts, axis=-1)
        ctx_ref[:, lo:lo + group_width] = ctx_g.astype(ctx_ref.dtype)    # lane-dense store

    # ---- BertSelfOutput: dense -> (dropout = identity) -> residual -> LayerNorm ----
    y = jnp.dot(ctx_ref[...], wo_ref[...],
                preferred_element_type=jnp.float32) + bo_ref[...]
    y = y + x_res
    mean = jnp.mean(y, axis=-1, keepdims=True)
    var = jnp.mean((y - mean) * (y - mean), axis=-1, keepdims=True)
    y = (y - mean) * lax.rsqrt(var + eps)
    y = y * gamma_ref[...] + beta_ref[...]
    out_ref[0] = y.astype(out_ref.dtype)


def prepare_attention_params(params, compute_dtype=jnp.bfloat16):
    """One-time weight prep, hoisted out of the per-call path.

    nn.Linear stores weight as (out, in) and computes x @ W.T + b, so transpose to
    (in, out). Wq is kept separate (projected per query tile); Wk|Wv are fused into a
    single (H, 2H) slab (projected once per batch element). Matmul weights are
    pre-cast to the bf16 MXU compute dtype; biases / LayerNorm affine stay f32.
    """
    H = params["wq"].shape[0]
    return {
        "wq_t": params["wq"].T.astype(compute_dtype),                          # (H, H)
        "bq": params["bq"].reshape(1, H).astype(jnp.float32),
        "wkv_t": jnp.concatenate([params["wk"].T, params["wv"].T],
                                 axis=1).astype(compute_dtype),                 # (H, 2H)
        "bkv": jnp.concatenate([params["bk"], params["bv"]],
                               axis=0).reshape(1, 2 * H).astype(jnp.float32),
        "wo_t": params["wo"].T.astype(compute_dtype),                           # (H, H)
        "bo": params["bo"].reshape(1, H).astype(jnp.float32),
        "gamma": params["gamma"].reshape(1, H).astype(jnp.float32),
        "beta": params["beta"].reshape(1, H).astype(jnp.float32),
    }


def _pick_tile(s, cap):
    """Largest tile <= cap that divides s and is a multiple of 8 (else s itself)."""
    if s <= cap:
        return s
    t = cap - (cap % 8)
    while t >= 8:
        if s % t == 0:
            return t
        t -= 8
    return s


def _heads_per_group(num_heads, head_size):
    """Heads per group so each group's lane width is a multiple of 128 if possible."""
    if head_size % 128 == 0:
        return 1
    if 128 % head_size == 0 and num_heads % (128 // head_size) == 0:
        return 128 // head_size
    return num_heads          # fallback: one full-row group (store whole rows)


def bert_attention(hidden_states, prepped, *, num_heads, eps=1e-12,
                   q_tile=None, kv_tile=None, single_buffer_weights=True):
    """hidden_states: (B, S, H) float32. `prepped` from prepare_attention_params."""
    B, S, H = hidden_states.shape
    assert H % num_heads == 0
    head_size = H // num_heads

    if q_tile is None:
        q_tile = S if S <= 1024 else _pick_tile(S, 512)
    assert S % q_tile == 0 and (q_tile == S or q_tile % 8 == 0)
    n_q_tiles = S // q_tile

    if kv_tile is None:
        kv_tile = S if S <= 1024 else _pick_tile(S, 512)
    assert S % kv_tile == 0

    heads_per_group = _heads_per_group(num_heads, head_size)

    kernel = functools.partial(
        bert_attention_kernel, num_heads=num_heads, head_size=head_size,
        heads_per_group=heads_per_group, q_tile=q_tile, kv_tile=kv_tile, eps=eps)

    cdt = prepped["wq_t"].dtype
    cbytes = jnp.dtype(cdt).itemsize

    # VMEM budget: single-buffered bf16 weights + bf16 scratches + double-buffered
    # f32 input/output blocks + activation temporaries, with headroom, clamped below
    # v7x's 64 MiB physical VMEM (56 MiB ceiling) per the review.
    wbytes = (2 * H * H + H * 2 * H) * cbytes + 7 * H * 4
    scratch_bytes = (S * 2 * H + 2 * q_tile * H) * cbytes
    io_bytes = (S * H * 4) * 2 + (q_tile * H * 4) * 2
    act_bytes = (q_tile * kv_tile * 4) * 4 * heads_per_group + (q_tile * H * 4) * 4
    vmem_limit = int(min(max(wbytes + scratch_bytes + io_bytes + act_bytes + (8 << 20),
                             32 << 20), 56 << 20))

    def build(use_buffered):
        def const2d(shape):
            kwargs = {"pipeline_mode": pl.Buffered(1)} if use_buffered else {}
            return pl.BlockSpec(shape, lambda b, qi: (0, 0), **kwargs)

        return pl.pallas_call(
            kernel,
            out_shape=jax.ShapeDtypeStruct((B, S, H), hidden_states.dtype),
            grid_spec=pltpu.PrefetchScalarGridSpec(
                num_scalar_prefetch=0,
                grid=(B, n_q_tiles),
                in_specs=[
                    pl.BlockSpec((1, S, H), lambda b, qi: (b, 0, 0)),  # hidden_states
                    const2d((H, H)),          # Wq^T      (bf16)
                    const2d((1, H)),          # bq        (f32)
                    const2d((H, 2 * H)),      # Wk^T|Wv^T (bf16)
                    const2d((1, 2 * H)),      # bk|bv     (f32)
                    const2d((H, H)),          # Wo^T      (bf16)
                    const2d((1, H)),          # bo
                    const2d((1, H)),          # LayerNorm gamma
                    const2d((1, H)),          # LayerNorm beta
                ],
                out_specs=pl.BlockSpec((1, q_tile, H), lambda b, qi: (b, qi, 0)),
                scratch_shapes=[
                    pltpu.VMEM((S, 2 * H), cdt),      # K|V, persistent per batch element
                    pltpu.VMEM((q_tile, H), cdt),     # per-tile Q
                    pltpu.VMEM((q_tile, H), cdt),     # merged per-head context
                ],
            ),
            compiler_params=pltpu.CompilerParams(
                # qi must be "arbitrary": K/V are computed at qi == 0 and reused by
                # later q-tiles of the same batch element; batch stays "parallel".
                dimension_semantics=("parallel", "arbitrary"),
                vmem_limit_bytes=vmem_limit,
            ),
        )

    args = (hidden_states, prepped["wq_t"], prepped["bq"], prepped["wkv_t"],
            prepped["bkv"], prepped["wo_t"], prepped["bo"], prepped["gamma"],
            prepped["beta"])

    if single_buffer_weights:
        try:
            return jax.block_until_ready(build(True)(*args))
        except Exception:
            # TODO(synk): pipeline_mode=pl.Buffered(1) not supported on this jax
            # build; fall back to default (double-buffered) constant weight specs.
            pass
    return build(False)(*args)


def bert_attention_reference(hidden_states, params, *, num_heads, eps=1e-12):
    """Pure-JAX f32 reference mirroring the PyTorch module (eval mode)."""
    B, S, H = hidden_states.shape
    dh = H // num_heads

    def linear(x, w, b):
        return jnp.einsum("bsh,oh->bso", x, w) + b

    q = linear(hidden_states, params["wq"], params["bq"])
    k = linear(hidden_states, params["wk"], params["bk"])
    v = linear(hidden_states, params["wv"], params["bv"])

    def split_heads(x):
        return x.reshape(B, S, num_heads, dh).transpose(0, 2, 1, 3)

    qh, kh, vh = split_heads(q), split_heads(k), split_heads(v)
    scores = jnp.einsum("bhqd,bhkd->bhqk", qh, kh) / math.sqrt(dh)
    probs = jax.nn.softmax(scores, axis=-1)
    ctx = jnp.einsum("bhqk,bhkd->bhqd", probs, vh)
    ctx = ctx.transpose(0, 2, 1, 3).reshape(B, S, H)

    y = jnp.einsum("bsh,oh->bso", ctx, params["wo"]) + params["bo"]
    y = y + hidden_states
    mean = jnp.mean(y, axis=-1, keepdims=True)
    var = jnp.mean((y - mean) ** 2, axis=-1, keepdims=True)
    y = (y - mean) / jnp.sqrt(var + eps)
    return y * params["gamma"] + params["beta"]


if __name__ == "__main__":
    # Small shapes; head_size=64 exercises the 128-lane head-pair path.
    B, S, H = 2, 8, 128
    NUM_HEADS = 2

    key = jax.random.PRNGKey(0)
    keys = jax.random.split(key, 10)

    scale = 0.05
    params = {
        "wq": scale * jax.random.normal(keys[0], (H, H), jnp.float32),
        "bq": scale * jax.random.normal(keys[1], (H,), jnp.float32),
        "wk": scale * jax.random.normal(keys[2], (H, H), jnp.float32),
        "bk": scale * jax.random.normal(keys[3], (H,), jnp.float32),
        "wv": scale * jax.random.normal(keys[4], (H, H), jnp.float32),
        "bv": scale * jax.random.normal(keys[5], (H,), jnp.float32),
        "wo": scale * jax.random.normal(keys[6], (H, H), jnp.float32),
        "bo": scale * jax.random.normal(keys[7], (H,), jnp.float32),
        "gamma": jnp.ones((H,), jnp.float32),
        "beta": jnp.zeros((H,), jnp.float32),
    }

    hidden_states = jax.random.normal(keys[8], (B, S, H), jnp.float32)

    # Weight fusion / transpose / bf16 cast done ONCE outside the per-call path.
    prepped = prepare_attention_params(params)

    out = bert_attention(hidden_states, prepped, num_heads=NUM_HEADS)
    out = jax.block_until_ready(out)

    ref = bert_attention_reference(hidden_states, params, num_heads=NUM_HEADS)
    assert out.shape == (B, S, H)
    max_err = float(jnp.max(jnp.abs(out - ref)))
    # bf16 MXU matmuls (f32 accumulation) + approx reciprocal -> relaxed tolerance.
    assert jnp.allclose(out, ref, atol=2e-2, rtol=2e-2), (
        f"mismatch vs JAX reference (max abs err {max_err})")

    print("KERNEL_OK")
</pallas_src>

<mosaic_0001>
module attributes {stable_mosaic.version = 11 : i64} {
  func.func @bert_attention_kernel(%arg0: i32, %arg1: i32, %arg2: memref<1x8x128xf32, #tpu.memory_space<vmem>>, %arg3: memref<128x128xbf16, #tpu.memory_space<vmem>>, %arg4: memref<1x128xf32, #tpu.memory_space<vmem>>, %arg5: memref<128x256xbf16, #tpu.memory_space<vmem>>, %arg6: memref<1x256xf32, #tpu.memory_space<vmem>>, %arg7: memref<128x128xbf16, #tpu.memory_space<vmem>>, %arg8: memref<1x128xf32, #tpu.memory_space<vmem>>, %arg9: memref<1x128xf32, #tpu.memory_space<vmem>>, %arg10: memref<1x128xf32, #tpu.memory_space<vmem>>, %arg11: memref<1x8x128xf32, #tpu.memory_space<vmem>>, %arg12: memref<8x256xbf16, #tpu.memory_space<vmem>>, %arg13: memref<8x128xbf16, #tpu.memory_space<vmem>>, %arg14: memref<8x128xbf16, #tpu.memory_space<vmem>>) attributes {dimension_semantics = [#tpu.dimension_semantics<parallel>, #tpu.dimension_semantics<arbitrary>], iteration_bounds = array<i64: 2, 1>, scalar_prefetch = 0 : i64, scratch_operands = 3 : i64, tpu.core_type = #tpu.core_type<tc>, window_params = [{transform_indices = @transform_0, window_bounds = array<i64: 1, 8, 128>}, {pipeline_mode = #tpu.pipeline_mode<synchronous>, transform_indices = @transform_1, window_bounds = array<i64: 128, 128>}, {pipeline_mode = #tpu.pipeline_mode<synchronous>, transform_indices = @transform_2, window_bounds = array<i64: 1, 128>}, {pipeline_mode = #tpu.pipeline_mode<synchronous>, transform_indices = @transform_3, window_bounds = array<i64: 128, 256>}, {pipeline_mode = #tpu.pipeline_mode<synchronous>, transform_indices = @transform_4, window_bounds = array<i64: 1, 256>}, {pipeline_mode = #tpu.pipeline_mode<synchronous>, transform_indices = @transform_5, window_bounds = array<i64: 128, 128>}, {pipeline_mode = #tpu.pipeline_mode<synchronous>, transform_indices = @transform_6, window_bounds = array<i64: 1, 128>}, {pipeline_mode = #tpu.pipeline_mode<synchronous>, transform_indices = @transform_7, window_bounds = array<i64: 1, 128>}, {pipeline_mode = #tpu.pipeline_mode<synchronous>, transform_indices = @transform_8, window_bounds = array<i64: 1, 128>}, {transform_indices = @transform_9, window_bounds = array<i64: 1, 8, 128>}]} {
    %c0_i32 = arith.constant 0 : i32
    %0 = arith.cmpi eq, %arg1, %c0_i32 : i32
    %1 = arith.extui %0 : i1 to i32
    %c0_i32_0 = arith.constant 0 : i32
    %2 = arith.cmpi ne, %1, %c0_i32_0 : i32
    scf.if %2 {
      %c0_50 = arith.constant 0 : index
      %c0_51 = arith.constant 0 : index
      %c0_52 = arith.constant 0 : index
      %116 = vector.load %arg2[%c0_50, %c0_51, %c0_52] : memref<1x8x128xf32, #tpu.memory_space<vmem>>, vector<1x8x128xf32>
      %117 = vector.shape_cast %116 : vector<1x8x128xf32> to vector<8x128xf32>
      %118 = arith.truncf %117 : vector<8x128xf32> to vector<8x128xbf16>
      %c0_53 = arith.constant 0 : index
      %c0_54 = arith.constant 0 : index
      %119 = vector.load %arg5[%c0_53, %c0_54] : memref<128x256xbf16, #tpu.memory_space<vmem>>, vector<128x256xbf16>
      %cst_55 = arith.constant dense<0.000000e+00> : vector<8x256xf32>
      %120 = tpu.matmul %118, %119, %cst_55 {dimension_numbers = #tpu.dot_dimension_numbers<[1], [0], [0], [1], [0, 0, 1, 1], [], []>} : vector<8x128xbf16>, vector<128x256xbf16>, vector<8x256xf32> -> vector<8x256xf32>
      %c0_56 = arith.constant 0 : index
      %c0_57 = arith.constant 0 : index
      %121 = vector.load %arg6[%c0_56, %c0_57] : memref<1x256xf32, #tpu.memory_space<vmem>>, vector<1x256xf32>
      %122 = vector.broadcast %121 : vector<1x256xf32> to vector<8x256xf32>
      %123 = arith.addf %120, %122 : vector<8x256xf32>
      %124 = arith.truncf %123 : vector<8x256xf32> to vector<8x256xbf16>
      %c0_58 = arith.constant 0 : index
      %c0_59 = arith.constant 0 : index
      %125 = vector.load %arg12[%c0_58, %c0_59] : memref<8x256xbf16, #tpu.memory_space<vmem>>, vector<8x256xbf16>
      tpu.vector_store %arg12[%c0_58, %c0_59], %124 {strides = array<i32>} : memref<8x256xbf16, #tpu.memory_space<vmem>>, vector<8x256xbf16>,
    } else {
    }
    %c8_i32 = arith.constant 8 : i32
    %3 = arith.muli %arg1, %c8_i32 : i32
    %4 = tpu.assume_multiple %3, 8 : i32
    %c0 = arith.constant 0 : index
    %5 = arith.index_cast %4 : i32 to index
    %c0_1 = arith.constant 0 : index
    %6 = vector.load %arg2[%c0, %5, %c0_1] : memref<1x8x128xf32, #tpu.memory_space<vmem>>, vector<1x8x128xf32>
    %7 = vector.shape_cast %6 : vector<1x8x128xf32> to vector<8x128xf32>
    %8 = arith.truncf %7 : vector<8x128xf32> to vector<8x128xbf16>
    %c0_2 = arith.constant 0 : index
    %c0_3 = arith.constant 0 : index
    %9 = vector.load %arg3[%c0_2, %c0_3] : memref<128x128xbf16, #tpu.memory_space<vmem>>, vector<128x128xbf16>
    %cst = arith.constant dense<0.000000e+00> : vector<8x128xf32>
    %10 = tpu.matmul %8, %9, %cst {dimension_numbers = #tpu.dot_dimension_numbers<[1], [0], [0], [1], [0, 0, 1, 1], [], []>} : vector<8x128xbf16>, vector<128x128xbf16>, vector<8x128xf32> -> vector<8x128xf32>
    %c0_4 = arith.constant 0 : index
    %c0_5 = arith.constant 0 : index
    %11 = vector.load %arg4[%c0_4, %c0_5] : memref<1x128xf32, #tpu.memory_space<vmem>>, vector<1x128xf32>
    %12 = vector.broadcast %11 : vector<1x128xf32> to vector<8x128xf32>
    %13 = arith.addf %10, %12 : vector<8x128xf32>
    %14 = arith.truncf %13 : vector<8x128xf32> to vector<8x128xbf16>
    %c0_6 = arith.constant 0 : index
    %c0_7 = arith.constant 0 : index
    %15 = vector.load %arg13[%c0_6, %c0_7] : memref<8x128xbf16, #tpu.memory_space<vmem>>, vector<8x128xbf16>
    tpu.vector_store %arg13[%c0_6, %c0_7], %14 {strides = array<i32>} : memref<8x128xbf16, #tpu.memory_space<vmem>>, vector<8x128xbf16>,
    %c0_8 = arith.constant 0 : index
    %c0_9 = arith.constant 0 : index
    %16 = vector.load %arg13[%c0_8, %c0_9] : memref<8x128xbf16, #tpu.memory_space<vmem>>, vector<8x128xbf16>
    %cst_10 = arith.constant 0xFF800000 : f32
    %17 = vector.broadcast %cst_10 : f32 to vector<8x1xf32>
    %cst_11 = arith.constant 0xFF800000 : f32
    %18 = vector.broadcast %cst_11 : f32 to vector<8x1xf32>
    %cst_12 = arith.constant 0.000000e+00 : f32
    %19 = vector.broadcast %cst_12 : f32 to vector<8x1xf32>
    %cst_13 = arith.constant 0.000000e+00 : f32
    %20 = vector.broadcast %cst_13 : f32 to vector<8x1xf32>
    %cst_14 = arith.constant 0.000000e+00 : f32
    %21 = vector.broadcast %cst_14 : f32 to vector<8x64xf32>
    %cst_15 = arith.constant 0.000000e+00 : f32
    %22 = vector.broadcast %cst_15 : f32 to vector<8x64xf32>
    %c0_16 = arith.constant 0 : index
    %c0_17 = arith.constant 0 : index
    %23 = vector.load %arg12[%c0_16, %c0_17] : memref<8x256xbf16, #tpu.memory_space<vmem>>, vector<8x128xbf16>
    %c0_18 = arith.constant 0 : index
    %c128 = arith.constant 128 : index
    %24 = vector.load %arg12[%c0_18, %c128] : memref<8x256xbf16, #tpu.memory_space<vmem>>, vector<8x128xbf16>
    %25 = vector.extract_strided_slice %16 {offsets = [0, 0], sizes = [8, 64], strides = [1, 1]} : vector<8x128xbf16> to vector<8x64xbf16>
    %26 = vector.extract_strided_slice %23 {offsets = [0, 0], sizes = [8, 64], strides = [1, 1]} : vector<8x128xbf16> to vector<8x64xbf16>
    %27 = vector.extract_strided_slice %24 {offsets = [0, 0], sizes = [8, 64], strides = [1, 1]} : vector<8x128xbf16> to vector<8x64xbf16>
    %cst_19 = arith.constant dense<0.000000e+00> : vector<8x8xf32>
    %28 = tpu.matmul %25, %26, %cst_19 {dimension_numbers = #tpu.dot_dimension_numbers<[1], [1], [0], [0], [0, 0, 1, 0], [], []>} : vector<8x64xbf16>, vector<8x64xbf16>, vector<8x8xf32> -> vector<8x8xf32>
    %cst_20 = arith.constant 1.250000e-01 : f32
    %29 = vector.broadcast %cst_20 : f32 to vector<8x8xf32>
    %30 = arith.mulf %28, %29 : vector<8x8xf32>
    %cst_21 = arith.constant dense<0xFF800000> : vector<8xf32>
    %31 = vector.multi_reduction <maximumf>, %30, %cst_21 [1] : vector<8x8xf32> to vector<8xf32>
    %32 = vector.shape_cast %31 : vector<8xf32> to vector<8x1xf32>
    %33 = arith.maximumf %17, %32 : vector<8x1xf32>
    %34 = arith.subf %17, %33 : vector<8x1xf32>
    %35 = math.exp %34 : vector<8x1xf32>
    %36 = vector.broadcast %33 : vector<8x1xf32> to vector<8x8xf32>
    %37 = arith.subf %30, %36 : vector<8x8xf32>
    %38 = math.exp %37 : vector<8x8xf32>
    %39 = arith.mulf %35, %19 : vector<8x1xf32>
    %cst_22 = arith.constant dense<0.000000e+00> : vector<8xf32>
    %40 = vector.multi_reduction <add>, %38, %cst_22 [1] : vector<8x8xf32> to vector<8xf32>
    %41 = vector.shape_cast %40 : vector<8xf32> to vector<8x1xf32>
    %42 = arith.addf %39, %41 : vector<8x1xf32>
    %43 = vector.broadcast %35 : vector<8x1xf32> to vector<8x64xf32>
    %44 = arith.mulf %43, %21 : vector<8x64xf32>
    %45 = arith.truncf %38 : vector<8x8xf32> to vector<8x8xbf16>
    %cst_23 = arith.constant dense<0.000000e+00> : vector<8x64xf32>
    %46 = tpu.matmul %45, %27, %cst_23 {dimension_numbers = #tpu.dot_dimension_numbers<[1], [0], [0], [1], [0, 0, 1, 1], [], []>} : vector<8x8xbf16>, vector<8x64xbf16>, vector<8x64xf32> -> vector<8x64xf32>
    %47 = arith.addf %44, %46 : vector<8x64xf32>
    %48 = vector.extract_strided_slice %16 {offsets = [0, 64], sizes = [8, 64], strides = [1, 1]} : vector<8x128xbf16> to vector<8x64xbf16>
    %49 = vector.extract_strided_slice %23 {offsets = [0, 64], sizes = [8, 64], strides = [1, 1]} : vector<8x128xbf16> to vector<8x64xbf16>
    %50 = vector.extract_strided_slice %24 {offsets = [0, 64], sizes = [8, 64], strides = [1, 1]} : vector<8x128xbf16> to vector<8x64xbf16>
    %cst_24 = arith.constant dense<0.000000e+00> : vector<8x8xf32>
    %51 = tpu.matmul %48, %49, %cst_24 {dimension_numbers = #tpu.dot_dimension_numbers<[1], [1], [0], [0], [0, 0, 1, 0], [], []>} : vector<8x64xbf16>, vector<8x64xbf16>, vector<8x8xf32> -> vector<8x8xf32>
    %cst_25 = arith.constant 1.250000e-01 : f32
    %52 = vector.broadcast %cst_25 : f32 to vector<8x8xf32>
    %53 = arith.mulf %51, %52 : vector<8x8xf32>
    %cst_26 = arith.constant dense<0xFF800000> : vector<8xf32>
    %54 = vector.multi_reduction <maximumf>, %53, %cst_26 [1] : vector<8x8xf32> to vector<8xf32>
    %55 = vector.shape_cast %54 : vector<8xf32> to vector<8x1xf32>
    %56 = arith.maximumf %18, %55 : vector<8x1xf32>
    %57 = arith.subf %18, %56 : vector<8x1xf32>
    %58 = math.exp %57 : vector<8x1xf32>
    %59 = vector.broadcast %56 : vector<8x1xf32> to vector<8x8xf32>
    %60 = arith.subf %53, %59 : vector<8x8xf32>
    %61 = math.exp %60 : vector<8x8xf32>
    %62 = arith.mulf %58, %20 : vector<8x1xf32>
    %cst_27 = arith.constant dense<0.000000e+00> : vector<8xf32>
    %63 = vector.multi_reduction <add>, %61, %cst_27 [1] : vector<8x8xf32> to vector<8xf32>
    %64 = vector.shape_cast %63 : vector<8xf32> to vector<8x1xf32>
    %65 = arith.addf %62, %64 : vector<8x1xf32>
    %66 = vector.broadcast %58 : vector<8x1xf32> to vector<8x64xf32>
    %67 = arith.mulf %66, %22 : vector<8x64xf32>
    %68 = arith.truncf %61 : vector<8x8xf32> to vector<8x8xbf16>
    %cst_28 = arith.constant dense<0.000000e+00> : vector<8x64xf32>
    %69 = tpu.matmul %68, %50, %cst_28 {dimension_numbers = #tpu.dot_dimension_numbers<[1], [0], [0], [1], [0, 0, 1, 1], [], []>} : vector<8x8xbf16>, vector<8x64xbf16>, vector<8x64xf32> -> vector<8x64xf32>
    %70 = arith.addf %67, %69 : vector<8x64xf32>
    %71 = tpu.reciprocal %42 {approx = true} : vector<8x1xf32> -> vector<8x1xf32>
    %72 = vector.broadcast %71 : vector<8x1xf32> to vector<8x64xf32>
    %73 = arith.mulf %47, %72 : vector<8x64xf32>
    %74 = tpu.reciprocal %65 {approx = true} : vector<8x1xf32> -> vector<8x1xf32>
    %75 = vector.broadcast %74 : vector<8x1xf32> to vector<8x64xf32>
    %76 = arith.mulf %70, %75 : vector<8x64xf32>
    %77 = tpu.concatenate %73, %76 in 1 : vector<8x64xf32>, vector<8x64xf32> -> vector<8x128xf32>
    %78 = arith.truncf %77 : vector<8x128xf32> to vector<8x128xbf16>
    %c0_29 = arith.constant 0 : index
    %c0_30 = arith.constant 0 : index
    %79 = vector.load %arg14[%c0_29, %c0_30] : memref<8x128xbf16, #tpu.memory_space<vmem>>, vector<8x128xbf16>
    tpu.vector_store %arg14[%c0_29, %c0_30], %78 {strides = array<i32>} : memref<8x128xbf16, #tpu.memory_space<vmem>>, vector<8x128xbf16>,
    %c0_31 = arith.constant 0 : index
    %c0_32 = arith.constant 0 : index
    %80 = vector.load %arg14[%c0_31, %c0_32] : memref<8x128xbf16, #tpu.memory_space<vmem>>, vector<8x128xbf16>
    %c0_33 = arith.constant 0 : index
    %c0_34 = arith.constant 0 : index
    %81 = vector.load %arg7[%c0_33, %c0_34] : memref<128x128xbf16, #tpu.memory_space<vmem>>, vector<128x128xbf16>
    %cst_35 = arith.constant dense<0.000000e+00> : vector<8x128xf32>
    %82 = tpu.matmul %80, %81, %cst_35 {dimension_numbers = #tpu.dot_dimension_numbers<[1], [0], [0], [1], [0, 0, 1, 1], [], []>} : vector<8x128xbf16>, vector<128x128xbf16>, vector<8x128xf32> -> vector<8x128xf32>
    %c0_36 = arith.constant 0 : index
    %c0_37 = arith.constant 0 : index
    %83 = vector.load %arg8[%c0_36, %c0_37] : memref<1x128xf32, #tpu.memory_space<vmem>>, vector<1x128xf32>
    %84 = vector.broadcast %83 : vector<1x128xf32> to vector<8x128xf32>
    %85 = arith.addf %82, %84 : vector<8x128xf32>
    %86 = arith.addf %85, %7 : vector<8x128xf32>
    %cst_38 = arith.constant dense<0.000000e+00> : vector<8xf32>
    %87 = vector.multi_reduction <add>, %86, %cst_38 [1] : vector<8x128xf32> to vector<8xf32>
    %88 = vector.shape_cast %87 : vector<8xf32> to vector<8x1xf32>
    %cst_39 = arith.constant 1.280000e+02 : f32
    %89 = vector.broadcast %cst_39 : f32 to vector<8x1xf32>
    %90 = arith.divf %88, %89 : vector<8x1xf32>
    %91 = vector.broadcast %90 : vector<8x1xf32> to vector<8x128xf32>
    %92 = arith.subf %86, %91 : vector<8x128xf32>
    %93 = vector.broadcast %90 : vector<8x1xf32> to vector<8x128xf32>
    %94 = arith.subf %86, %93 : vector<8x128xf32>
    %95 = arith.mulf %92, %94 : vector<8x128xf32>
    %cst_40 = arith.constant dense<0.000000e+00> : vector<8xf32>
    %96 = vector.multi_reduction <add>, %95, %cst_40 [1] : vector<8x128xf32> to vector<8xf32>
    %97 = vector.shape_cast %96 : vector<8xf32> to vector<8x1xf32>
    %cst_41 = arith.constant 1.280000e+02 : f32
    %98 = vector.broadcast %cst_41 : f32 to vector<8x1xf32>
    %99 = arith.divf %97, %98 : vector<8x1xf32>
    %100 = vector.broadcast %90 : vector<8x1xf32> to vector<8x128xf32>
    %101 = arith.subf %86, %100 : vector<8x128xf32>
    %cst_42 = arith.constant 9.99999996E-13 : f32
    %102 = vector.broadcast %cst_42 : f32 to vector<8x1xf32>
    %103 = arith.addf %99, %102 : vector<8x1xf32>
    %104 = math.rsqrt %103 : vector<8x1xf32>
    %105 = vector.broadcast %104 : vector<8x1xf32> to vector<8x128xf32>
    %106 = arith.mulf %101, %105 : vector<8x128xf32>
    %c0_43 = arith.constant 0 : index
    %c0_44 = arith.constant 0 : index
    %107 = vector.load %arg9[%c0_43, %c0_44] : memref<1x128xf32, #tpu.memory_space<vmem>>, vector<1x128xf32>
    %108 = vector.broadcast %107 : vector<1x128xf32> to vector<8x128xf32>
    %109 = arith.mulf %106, %108 : vector<8x128xf32>
    %c0_45 = arith.constant 0 : index
    %c0_46 = arith.constant 0 : index
    %110 = vector.load %arg10[%c0_45, %c0_46] : memref<1x128xf32, #tpu.memory_space<vmem>>, vector<1x128xf32>
    %111 = vector.broadcast %110 : vector<1x128xf32> to vector<8x128xf32>
    %112 = arith.addf %109, %111 : vector<8x128xf32>
    %c0_47 = arith.constant 0 : index
    %c0_48 = arith.constant 0 : index
    %c0_49 = arith.constant 0 : index
    %113 = vector.load %arg11[%c0_47, %c0_48, %c0_49] : memref<1x8x128xf32, #tpu.memory_space<vmem>>, vector<1x8x128xf32>
    %114 = vector.shape_cast %113 : vector<1x8x128xf32> to vector<8x128xf32>
    %115 = vector.shape_cast %112 : vector<8x128xf32> to vector<1x8x128xf32>
    tpu.vector_store %arg11[%c0_47, %c0_48, %c0_49], %115 {strides = array<i32>} : memref<1x8x128xf32, #tpu.memory_space<vmem>>, vector<1x8x128xf32>,
    return
  }
  func.func @transform_0(%arg0: i32, %arg1: i32) -> (i32, i32, i32) {
    %c0_i32 = arith.constant 0 : i32
    %c0_i32_0 = arith.constant 0 : i32
    %c0_i32_1 = arith.constant 0 : i32
    return %arg0, %c0_i32, %c0_i32_0 : i32, i32, i32
  }
  func.func @transform_1(%arg0: i32, %arg1: i32) -> (i32, i32) {
    %c0_i32 = arith.constant 0 : i32
    %c0_i32_0 = arith.constant 0 : i32
    %c0_i32_1 = arith.constant 0 : i32
    return %c0_i32, %c0_i32_0 : i32, i32
  }
  func.func @transform_2(%arg0: i32, %arg1: i32) -> (i32, i32) {
    %c0_i32 = arith.constant 0 : i32
    %c0_i32_0 = arith.constant 0 : i32
    %c0_i32_1 = arith.constant 0 : i32
    return %c0_i32, %c0_i32_0 : i32, i32
  }
  func.func @transform_3(%arg0: i32, %arg1: i32) -> (i32, i32) {
    %c0_i32 = arith.constant 0 : i32
    %c0_i32_0 = arith.constant 0 : i32
    %c0_i32_1 = arith.constant 0 : i32
    return %c0_i32, %c0_i32_0 : i32, i32
  }
  func.func @transform_4(%arg0: i32, %arg1: i32) -> (i32, i32) {
    %c0_i32 = arith.constant 0 : i32
    %c0_i32_0 = arith.constant 0 : i32
    %c0_i32_1 = arith.constant 0 : i32
    return %c0_i32, %c0_i32_0 : i32, i32
  }
  func.func @transform_5(%arg0: i32, %arg1: i32) -> (i32, i32) {
    %c0_i32 = arith.constant 0 : i32
    %c0_i32_0 = arith.constant 0 : i32
    %c0_i32_1 = arith.constant 0 : i32
    return %c0_i32, %c0_i32_0 : i32, i32
  }
  func.func @transform_6(%arg0: i32, %arg1: i32) -> (i32, i32) {
    %c0_i32 = arith.constant 0 : i32
    %c0_i32_0 = arith.constant 0 : i32
    %c0_i32_1 = arith.constant 0 : i32
    return %c0_i32, %c0_i32_0 : i32, i32
  }
  func.func @transform_7(%arg0: i32, %arg1: i32) -> (i32, i32) {
    %c0_i32 = arith.constant 0 : i32
    %c0_i32_0 = arith.constant 0 : i32
    %c0_i32_1 = arith.constant 0 : i32
    return %c0_i32, %c0_i32_0 : i32, i32
  }
  func.func @transform_8(%arg0: i32, %arg1: i32) -> (i32, i32) {
    %c0_i32 = arith.constant 0 : i32
    %c0_i32_0 = arith.constant 0 : i32
    %c0_i32_1 = arith.constant 0 : i32
    return %c0_i32, %c0_i32_0 : i32, i32
  }
  func.func @transform_9(%arg0: i32, %arg1: i32) -> (i32, i32, i32) {
    %c0_i32 = arith.constant 0 : i32
    %c0_i32_0 = arith.constant 0 : i32
    return %arg0, %arg1, %c0_i32 : i32, i32, i32
  }
}

module attributes {stable_mosaic.version = 11 : i64} {
  func.func @bert_attention_kernel(%arg0: i32, %arg1: i32, %arg2: memref<1x8x128xf32, #tpu.memory_space<vmem>>, %arg3: memref<128x128xbf16, #tpu.memory_space<vmem>>, %arg4: memref<1x128xf32, #tpu.memory_space<vmem>>, %arg5: memref<128x256xbf16, #tpu.memory_space<vmem>>, %arg6: memref<1x256xf32, #tpu.memory_space<vmem>>, %arg7: memref<128x128xbf16, #tpu.memory_space<vmem>>, %arg8: memref<1x128xf32, #tpu.memory_space<vmem>>, %arg9: memref<1x128xf32, #tpu.memory_space<vmem>>, %arg10: memref<1x128xf32, #tpu.memory_space<vmem>>, %arg11: memref<1x8x128xf32, #tpu.memory_space<vmem>>, %arg12: memref<8x256xbf16, #tpu.memory_space<vmem>>, %arg13: memref<8x128xbf16, #tpu.memory_space<vmem>>, %arg14: memref<8x128xbf16, #tpu.memory_space<vmem>>) attributes {dimension_semantics = [#tpu.dimension_semantics<parallel>, #tpu.dimension_semantics<arbitrary>], iteration_bounds = array<i64: 2, 1>, scalar_prefetch = 0 : i64, scratch_operands = 3 : i64, tpu.core_type = #tpu.core_type<tc>, window_params = [{transform_indices = @transform_0, window_bounds = array<i64: 1, 8, 128>}, {pipeline_mode = #tpu.pipeline_mode<synchronous>, transform_indices = @transform_1, window_bounds = array<i64: 128, 128>}, {pipeline_mode = #tpu.pipeline_mode<synchronous>, transform_indices = @transform_2, window_bounds = array<i64: 1, 128>}, {pipeline_mode = #tpu.pipeline_mode<synchronous>, transform_indices = @transform_3, window_bounds = array<i64: 128, 256>}, {pipeline_mode = #tpu.pipeline_mode<synchronous>, transform_indices = @transform_4, window_bounds = array<i64: 1, 256>}, {pipeline_mode = #tpu.pipeline_mode<synchronous>, transform_indices = @transform_5, window_bounds = array<i64: 128, 128>}, {pipeline_mode = #tpu.pipeline_mode<synchronous>, transform_indices = @transform_6, window_bounds = array<i64: 1, 128>}, {pipeline_mode = #tpu.pipeline_mode<synchronous>, transform_indices = @transform_7, window_bounds = array<i64: 1, 128>}, {pipeline_mode = #tpu.pipeline_mode<synchronous>, transform_indices = @transform_8, window_bounds = array<i64: 1, 128>}, {transform_indices = @transform_9, window_bounds = array<i64: 1, 8, 128>}]} {
    %c0_i32 = arith.constant 0 : i32
    %0 = arith.cmpi eq, %arg1, %c0_i32 : i32
    %1 = arith.extui %0 : i1 to i32
    %c0_i32_0 = arith.constant 0 : i32
    %2 = arith.cmpi ne, %1, %c0_i32_0 : i32
    scf.if %2 {
      %c0_50 = arith.constant 0 : index
      %c0_51 = arith.constant 0 : index
      %c0_52 = arith.constant 0 : index
      %116 = vector.load %arg2[%c0_50, %c0_51, %c0_52] : memref<1x8x128xf32, #tpu.memory_space<vmem>>, vector<1x8x128xf32>
      %117 = vector.shape_cast %116 : vector<1x8x128xf32> to vector<8x128xf32>
      %118 = arith.truncf %117 : vector<8x128xf32> to vector<8x128xbf16>
      %c0_53 = arith.constant 0 : index
      %c0_54 = arith.constant 0 : index
      %119 = vector.load %arg5[%c0_53, %c0_54] : memref<128x256xbf16, #tpu.memory_space<vmem>>, vector<128x256xbf16>
      %cst_55 = arith.constant dense<0.000000e+00> : vector<8x256xf32>
      %120 = tpu.matmul %118, %119, %cst_55 {dimension_numbers = #tpu.dot_dimension_numbers<[1], [0], [0], [1], [0, 0, 1, 1], [], []>} : vector<8x128xbf16>, vector<128x256xbf16>, vector<8x256xf32> -> vector<8x256xf32>
      %c0_56 = arith.constant 0 : index
      %c0_57 = arith.constant 0 : index
      %121 = vector.load %arg6[%c0_56, %c0_57] : memref<1x256xf32, #tpu.memory_space<vmem>>, vector<1x256xf32>
      %122 = vector.broadcast %121 : vector<1x256xf32> to vector<8x256xf32>
      %123 = arith.addf %120, %122 : vector<8x256xf32>
      %124 = arith.truncf %123 : vector<8x256xf32> to vector<8x256xbf16>
      %c0_58 = arith.constant 0 : index
      %c0_59 = arith.constant 0 : index
      %125 = vector.load %arg12[%c0_58, %c0_59] : memref<8x256xbf16, #tpu.memory_space<vmem>>, vector<8x256xbf16>
      tpu.vector_store %arg12[%c0_58, %c0_59], %124 {strides = array<i32>} : memref<8x256xbf16, #tpu.memory_space<vmem>>, vector<8x256xbf16>,
    } else {
    }
    %c8_i32 = arith.constant 8 : i32
    %3 = arith.muli %arg1, %c8_i32 : i32
    %4 = tpu.assume_multiple %3, 8 : i32
    %c0 = arith.constant 0 : index
    %5 = arith.index_cast %4 : i32 to index
    %c0_1 = arith.constant 0 : index
    %6 = vector.load %arg2[%c0, %5, %c0_1] : memref<1x8x128xf32, #tpu.memory_space<vmem>>, vector<1x8x128xf32>
    %7 = vector.shape_cast %6 : vector<1x8x128xf32> to vector<8x128xf32>
    %8 = arith.truncf %7 : vector<8x128xf32> to vector<8x128xbf16>
    %c0_2 = arith.constant 0 : index
    %c0_3 = arith.constant 0 : index
    %9 = vector.load %arg3[%c0_2, %c0_3] : memref<128x128xbf16, #tpu.memory_space<vmem>>, vector<128x128xbf16>
    %cst = arith.constant dense<0.000000e+00> : vector<8x128xf32>
    %10 = tpu.matmul %8, %9, %cst {dimension_numbers = #tpu.dot_dimension_numbers<[1], [0], [0], [1], [0, 0, 1, 1], [], []>} : vector<8x128xbf16>, vector<128x128xbf16>, vector<8x128xf32> -> vector<8x128xf32>
    %c0_4 = arith.constant 0 : index
    %c0_5 = arith.constant 0 : index
    %11 = vector.load %arg4[%c0_4, %c0_5] : memref<1x128xf32, #tpu.memory_space<vmem>>, vector<1x128xf32>
    %12 = vector.broadcast %11 : vector<1x128xf32> to vector<8x128xf32>
    %13 = arith.addf %10, %12 : vector<8x128xf32>
    %14 = arith.truncf %13 : vector<8x128xf32> to vector<8x128xbf16>
    %c0_6 = arith.constant 0 : index
    %c0_7 = arith.constant 0 : index
    %15 = vector.load %arg13[%c0_6, %c0_7] : memref<8x128xbf16, #tpu.memory_space<vmem>>, vector<8x128xbf16>
    tpu.vector_store %arg13[%c0_6, %c0_7], %14 {strides = array<i32>} : memref<8x128xbf16, #tpu.memory_space<vmem>>, vector<8x128xbf16>,
    %c0_8 = arith.constant 0 : index
    %c0_9 = arith.constant 0 : index
    %16 = vector.load %arg13[%c0_8, %c0_9] : memref<8x128xbf16, #tpu.memory_space<vmem>>, vector<8x128xbf16>
    %cst_10 = arith.constant 0xFF800000 : f32
    %17 = vector.broadcast %cst_10 : f32 to vector<8x1xf32>
    %cst_11 = arith.constant 0xFF800000 : f32
    %18 = vector.broadcast %cst_11 : f32 to vector<8x1xf32>
    %cst_12 = arith.constant 0.000000e+00 : f32
    %19 = vector.broadcast %cst_12 : f32 to vector<8x1xf32>
    %cst_13 = arith.constant 0.000000e+00 : f32
    %20 = vector.broadcast %cst_13 : f32 to vector<8x1xf32>
    %cst_14 = arith.constant 0.000000e+00 : f32
    %21 = vector.broadcast %cst_14 : f32 to vector<8x64xf32>
    %cst_15 = arith.constant 0.000000e+00 : f32
    %22 = vector.broadcast %cst_15 : f32 to vector<8x64xf32>
    %c0_16 = arith.constant 0 : index
    %c0_17 = arith.constant 0 : index
    %23 = vector.load %arg12[%c0_16, %c0_17] : memref<8x256xbf16, #tpu.memory_space<vmem>>, vector<8x128xbf16>
    %c0_18 = arith.constant 0 : index
    %c128 = arith.constant 128 : index
    %24 = vector.load %arg12[%c0_18, %c128] : memref<8x256xbf16, #tpu.memory_space<vmem>>, vector<8x128xbf16>
    %25 = vector.extract_strided_slice %16 {offsets = [0, 0], sizes = [8, 64], strides = [1, 1]} : vector<8x128xbf16> to vector<8x64xbf16>
    %26 = vector.extract_strided_slice %23 {offsets = [0, 0], sizes = [8, 64], strides = [1, 1]} : vector<8x128xbf16> to vector<8x64xbf16>
    %27 = vector.extract_strided_slice %24 {offsets = [0, 0], sizes = [8, 64], strides = [1, 1]} : vector<8x128xbf16> to vector<8x64xbf16>
    %cst_19 = arith.constant dense<0.000000e+00> : vector<8x8xf32>
    %28 = tpu.matmul %25, %26, %cst_19 {dimension_numbers = #tpu.dot_dimension_numbers<[1], [1], [0], [0], [0, 0, 1, 0], [], []>} : vector<8x64xbf16>, vector<8x64xbf16>, vector<8x8xf32> -> vector<8x8xf32>
    %cst_20 = arith.constant 1.250000e-01 : f32
    %29 = vector.broadcast %cst_20 : f32 to vector<8x8xf32>
    %30 = arith.mulf %28, %29 : vector<8x8xf32>
    %cst_21 = arith.constant dense<0xFF800000> : vector<8xf32>
    %31 = vector.multi_reduction <maximumf>, %30, %cst_21 [1] : vector<8x8xf32> to vector<8xf32>
    %32 = vector.shape_cast %31 : vector<8xf32> to vector<8x1xf32>
    %33 = arith.maximumf %17, %32 : vector<8x1xf32>
    %34 = arith.subf %17, %33 : vector<8x1xf32>
    %35 = math.exp %34 : vector<8x1xf32>
    %36 = vector.broadcast %33 : vector<8x1xf32> to vector<8x8xf32>
    %37 = arith.subf %30, %36 : vector<8x8xf32>
    %38 = math.exp %37 : vector<8x8xf32>
    %39 = arith.mulf %35, %19 : vector<8x1xf32>
    %cst_22 = arith.constant dense<0.000000e+00> : vector<8xf32>
    %40 = vector.multi_reduction <add>, %38, %cst_22 [1] : vector<8x8xf32> to vector<8xf32>
    %41 = vector.shape_cast %40 : vector<8xf32> to vector<8x1xf32>
    %42 = arith.addf %39, %41 : vector<8x1xf32>
    %43 = vector.broadcast %35 : vector<8x1xf32> to vector<8x64xf32>
    %44 = arith.mulf %43, %21 : vector<8x64xf32>
    %45 = arith.truncf %38 : vector<8x8xf32> to vector<8x8xbf16>
    %cst_23 = arith.constant dense<0.000000e+00> : vector<8x64xf32>
    %46 = tpu.matmul %45, %27, %cst_23 {dimension_numbers = #tpu.dot_dimension_numbers<[1], [0], [0], [1], [0, 0, 1, 1], [], []>} : vector<8x8xbf16>, vector<8x64xbf16>, vector<8x64xf32> -> vector<8x64xf32>
    %47 = arith.addf %44, %46 : vector<8x64xf32>
    %48 = vector.extract_strided_slice %16 {offsets = [0, 64], sizes = [8, 64], strides = [1, 1]} : vector<8x128xbf16> to vector<8x64xbf16>
    %49 = vector.extract_strided_slice %23 {offsets = [0, 64], sizes = [8, 64], strides = [1, 1]} : vector<8x128xbf16> to vector<8x64xbf16>
    %50 = vector.extract_strided_slice %24 {offsets = [0, 64], sizes = [8, 64], strides = [1, 1]} : vector<8x128xbf16> to vector<8x64xbf16>
    %cst_24 = arith.constant dense<0.000000e+00> : vector<8x8xf32>
    %51 = tpu.matmul %48, %49, %cst_24 {dimension_numbers = #tpu.dot_dimension_numbers<[1], [1], [0], [0], [0, 0, 1, 0], [], []>} : vector<8x64xbf16>, vector<8x64xbf16>, vector<8x8xf32> -> vector<8x8xf32>
    %cst_25 = arith.constant 1.250000e-01 : f32
    %52 = vector.broadcast %cst_25 : f32 to vector<8x8xf32>
    %53 = arith.mulf %51, %52 : vector<8x8xf32>
    %cst_26 = arith.constant dense<0xFF800000> : vector<8xf32>
    %54 = vector.multi_reduction <maximumf>, %53, %cst_26 [1] : vector<8x8xf32> to vector<8xf32>
    %55 = vector.shape_cast %54 : vector<8xf32> to vector<8x1xf32>
    %56 = arith.maximumf %18, %55 : vector<8x1xf32>
    %57 = arith.subf %18, %56 : vector<8x1xf32>
    %58 = math.exp %57 : vector<8x1xf32>
    %59 = vector.broadcast %56 : vector<8x1xf32> to vector<8x8xf32>
    %60 = arith.subf %53, %59 : vector<8x8xf32>
    %61 = math.exp %60 : vector<8x8xf32>
    %62 = arith.mulf %58, %20 : vector<8x1xf32>
    %cst_27 = arith.constant dense<0.000000e+00> : vector<8xf32>
    %63 = vector.multi_reduction <add>, %61, %cst_27 [1] : vector<8x8xf32> to vector<8xf32>
    %64 = vector.shape_cast %63 : vector<8xf32> to vector<8x1xf32>
    %65 = arith.addf %62, %64 : vector<8x1xf32>
    %66 = vector.broadcast %58 : vector<8x1xf32> to vector<8x64xf32>
    %67 = arith.mulf %66, %22 : vector<8x64xf32>
    %68 = arith.truncf %61 : vector<8x8xf32> to vector<8x8xbf16>
    %cst_28 = arith.constant dense<0.000000e+00> : vector<8x64xf32>
    %69 = tpu.matmul %68, %50, %cst_28 {dimension_numbers = #tpu.dot_dimension_numbers<[1], [0], [0], [1], [0, 0, 1, 1], [], []>} : vector<8x8xbf16>, vector<8x64xbf16>, vector<8x64xf32> -> vector<8x64xf32>
    %70 = arith.addf %67, %69 : vector<8x64xf32>
    %71 = tpu.reciprocal %42 {approx = true} : vector<8x1xf32> -> vector<8x1xf32>
    %72 = vector.broadcast %71 : vector<8x1xf32> to vector<8x64xf32>
    %73 = arith.mulf %47, %72 : vector<8x64xf32>
    %74 = tpu.reciprocal %65 {approx = true} : vector<8x1xf32> -> vector<8x1xf32>
    %75 = vector.broadcast %74 : vector<8x1xf32> to vector<8x64xf32>
    %76 = arith.mulf %70, %75 : vector<8x64xf32>
    %77 = tpu.concatenate %73, %76 in 1 : vector<8x64xf32>, vector<8x64xf32> -> vector<8x128xf32>
    %78 = arith.truncf %77 : vector<8x128xf32> to vector<8x128xbf16>
    %c0_29 = arith.constant 0 : index
    %c0_30 = arith.constant 0 : index
    %79 = vector.load %arg14[%c0_29, %c0_30] : memref<8x128xbf16, #tpu.memory_space<vmem>>, vector<8x128xbf16>
    tpu.vector_store %arg14[%c0_29, %c0_30], %78 {strides = array<i32>} : memref<8x128xbf16, #tpu.memory_space<vmem>>, vector<8x128xbf16>,
    %c0_31 = arith.constant 0 : index
    %c0_32 = arith.constant 0 : index
    %80 = vector.load %arg14[%c0_31, %c0_32] : memref<8x128xbf16, #tpu.memory_space<vmem>>, vector<8x128xbf16>
    %c0_33 = arith.constant 0 : index
    %c0_34 = arith.constant 0 : index
    %81 = vector.load %arg7[%c0_33, %c0_34] : memref<128x128xbf16, #tpu.memory_space<vmem>>, vector<128x128xbf16>
    %cst_35 = arith.constant dense<0.000000e+00> : vector<8x128xf32>
    %82 = tpu.matmul %80, %81, %cst_35 {dimension_numbers = #tpu.dot_dimension_numbers<[1], [0], [0], [1], [0, 0, 1, 1], [], []>} : vector<8x128xbf16>, vector<128x128xbf16>, vector<8x128xf32> -> vector<8x128xf32>
    %c0_36 = arith.constant 0 : index
    %c0_37 = arith.constant 0 : index
    %83 = vector.load %arg8[%c0_36, %c0_37] : memref<1x128xf32, #tpu.memory_space<vmem>>, vector<1x128xf32>
    %84 = vector.broadcast %83 : vector<1x128xf32> to vector<8x128xf32>
    %85 = arith.addf %82, %84 : vector<8x128xf32>
    %86 = arith.addf %85, %7 : vector<8x128xf32>
    %cst_38 = arith.constant dense<0.000000e+00> : vector<8xf32>
    %87 = vector.multi_reduction <add>, %86, %cst_38 [1] : vector<8x128xf32> to vector<8xf32>
    %88 = vector.shape_cast %87 : vector<8xf32> to vector<8x1xf32>
    %cst_39 = arith.constant 1.280000e+02 : f32
    %89 = vector.broadcast %cst_39 : f32 to vector<8x1xf32>
    %90 = arith.divf %88, %89 : vector<8x1xf32>
    %91 = vector.broadcast %90 : vector<8x1xf32> to vector<8x128xf32>
    %92 = arith.subf %86, %91 : vector<8x128xf32>
    %93 = vector.broadcast %90 : vector<8x1xf32> to vector<8x128xf32>
    %94 = arith.subf %86, %93 : vector<8x128xf32>
    %95 = arith.mulf %92, %94 : vector<8x128xf32>
    %cst_40 = arith.constant dense<0.000000e+00> : vector<8xf32>
    %96 = vector.multi_reduction <add>, %95, %cst_40 [1] : vector<8x128xf32> to vector<8xf32>
    %97 = vector.shape_cast %96 : vector<8xf32> to vector<8x1xf32>
    %cst_41 = arith.constant 1.280000e+02 : f32
    %98 = vector.broadcast %cst_41 : f32 to vector<8x1xf32>
    %99 = arith.divf %97, %98 : vector<8x1xf32>
    %100 = vector.broadcast %90 : vector<8x1xf32> to vector<8x128xf32>
    %101 = arith.subf %86, %100 : vector<8x128xf32>
    %cst_42 = arith.constant 9.99999996E-13 : f32
    %102 = vector.broadcast %cst_42 : f32 to vector<8x1xf32>
    %103 = arith.addf %99, %102 : vector<8x1xf32>
    %104 = math.rsqrt %103 : vector<8x1xf32>
    %105 = vector.broadcast %104 : vector<8x1xf32> to vector<8x128xf32>
    %106 = arith.mulf %101, %105 : vector<8x128xf32>
    %c0_43 = arith.constant 0 : index
    %c0_44 = arith.constant 0 : index
    %107 = vector.load %arg9[%c0_43, %c0_44] : memref<1x128xf32, #tpu.memory_space<vmem>>, vector<1x128xf32>
    %108 = vector.broadcast %107 : vector<1x128xf32> to vector<8x128xf32>
    %109 = arith.mulf %106, %108 : vector<8x128xf32>
    %c0_45 = arith.constant 0 : index
    %c0_46 = arith.constant 0 : index
    %110 = vector.load %arg10[%c0_45, %c0_46] : memref<1x128xf32, #tpu.memory_space<vmem>>, vector<1x128xf32>
    %111 = vector.broadcast %110 : vector<1x128xf32> to vector<8x128xf32>
    %112 = arith.addf %109, %111 : vector<8x128xf32>
    %c0_47 = arith.constant 0 : index
    %c0_48 = arith.constant 0 : index
    %c0_49 = arith.constant 0 : index
    %113 = vector.load %arg11[%c0_47, %c0_48, %c0_49] : memref<1x8x128xf32, #tpu.memory_space<vmem>>, vector<1x8x128xf32>
    %114 = vector.shape_cast %113 : vector<1x8x128xf32> to vector<8x128xf32>
    %115 = vector.shape_cast %112 : vector<8x128xf32> to vector<1x8x128xf32>
    tpu.vector_store %arg11[%c0_47, %c0_48, %c0_49], %115 {strides = array<i32>} : memref<1x8x128xf32, #tpu.memory_space<vmem>>, vector<1x8x128xf32>,
    return
  }
  func.func @transform_0(%arg0: i32, %arg1: i32) -> (i32, i32, i32) {
    %c0_i32 = arith.constant 0 : i32
    %c0_i32_0 = arith.constant 0 : i32
    %c0_i32_1 = arith.constant 0 : i32
    return %arg0, %c0_i32, %c0_i32_0 : i32, i32, i32
  }
  func.func @transform_1(%arg0: i32, %arg1: i32) -> (i32, i32) {
    %c0_i32 = arith.constant 0 : i32
    %c0_i32_0 = arith.constant 0 : i32
    %c0_i32_1 = arith.constant 0 : i32
    return %c0_i32, %c0_i32_0 : i32, i32
  }
  func.func @transform_2(%arg0: i32, %arg1: i32) -> (i32, i32) {
    %c0_i32 = arith.constant 0 : i32
    %c0_i32_0 = arith.constant 0 : i32
    %c0_i32_1 = arith.constant 0 : i32
    return %c0_i32, %c0_i32_0 : i32, i32
  }
  func.func @transform_3(%arg0: i32, %arg1: i32) -> (i32, i32) {
    %c0_i32 = arith.constant 0 : i32
    %c0_i32_0 = arith.constant 0 : i32
    %c0_i32_1 = arith.constant 0 : i32
    return %c0_i32, %c0_i32_0 : i32, i32
  }
  func.func @transform_4(%arg0: i32, %arg1: i32) -> (i32, i32) {
    %c0_i32 = arith.constant 0 : i32
    %c0_i32_0 = arith.constant 0 : i32
    %c0_i32_1 = arith.constant 0 : i32
    return %c0_i32, %c0_i32_0 : i32, i32
  }
  func.func @transform_5(%arg0: i32, %arg1: i32) -> (i32, i32) {
    %c0_i32 = arith.constant 0 : i32
    %c0_i32_0 = arith.constant 0 : i32
    %c0_i32_1 = arith.constant 0 : i32
    return %c0_i32, %c0_i32_0 : i32, i32
  }
  func.func @transform_6(%arg0: i32, %arg1: i32) -> (i32, i32) {
    %c0_i32 = arith.constant 0 : i32
    %c0_i32_0 = arith.constant 0 : i32
    %c0_i32_1 = arith.constant 0 : i32
    return %c0_i32, %c0_i32_0 : i32, i32
  }
  func.func @transform_7(%arg0: i32, %arg1: i32) -> (i32, i32) {
    %c0_i32 = arith.constant 0 : i32
    %c0_i32_0 = arith.constant 0 : i32
    %c0_i32_1 = arith.constant 0 : i32
    return %c0_i32, %c0_i32_0 : i32, i32
  }
  func.func @transform_8(%arg0: i32, %arg1: i32) -> (i32, i32) {
    %c0_i32 = arith.constant 0 : i32
    %c0_i32_0 = arith.constant 0 : i32
    %c0_i32_1 = arith.constant 0 : i32
    return %c0_i32, %c0_i32_0 : i32, i32
  }
  func.func @transform_9(%arg0: i32, %arg1: i32) -> (i32, i32, i32) {
    %c0_i32 = arith.constant 0 : i32
    %c0_i32_0 = arith.constant 0 : i32
    return %arg0, %arg1, %c0_i32 : i32, i32, i32
  }
}

</mosaic_0001>

<bundles_post_ra>
// kernel: tpu_custom_call.1
= control target key start
LH: loop header
LB: loop body
LE: loop exit
PB: predicated region body
PF: predicated region fallthrough
CT: control target
= control target key end

     0   :  { %s2048_s0 = inlined_call_operand.hbm [shape: f32[2,8,128], index: 0, kind: input, shape index: {}]   ;;  %s2049_s1 = inlined_call_operand.hbm [shape: bf16[128,128], index: 1, kind: input, shape index: {}]   ;;  %s2050_s2 = inlined_call_operand.vmem [shape: f32[1,128], index: 2, kind: input, shape index: {}]   ;;  %s2051_s3 = inlined_call_operand.hbm [shape: bf16[128,256], index: 3, kind: input, shape index: {}]   ;;  %s2052_s4 = inlined_call_operand.vmem [shape: f32[1,256], index: 4, kind: input, shape index: {}]   ;;  %s2053_s5 = inlined_call_operand.hbm [shape: bf16[128,128], index: 5, kind: input, shape index: {}]   ;;  %s2054_s6 = inlined_call_operand.vmem [shape: f32[1,128], index: 6, kind: input, shape index: {}]   ;;  %s2055_s7 = inlined_call_operand.vmem [shape: f32[1,128], index: 7, kind: input, shape index: {}]   ;;  %s2056_s8 = inlined_call_operand.vmem [shape: f32[1,128], index: 8, kind: input, shape index: {}]   ;;  %s2057_s9 = inlined_call_operand.hbm [shape: f32[2,8,128], index: 9, kind: output, shape index: {}]  }
   0x1   :  { %2062 = sst [smem:[#allocation21_spill]] %s2049_s1 }
   0x2   :  { %2063 = sst [smem:[#allocation22_spill]] %s2051_s3 }
   0x3   :  { %2064 = sst [smem:[#allocation23_spill]] %s2053_s5 }
   0x4   :  { %14 = vsyncpa [#allocation6], 0 }
   0x5   :  { %16 = vsyncpa [#allocation6 + $0x1], 0 }
   0x6   :  { %17 = vsyncpa [#allocation9], 0 }
   0x7   :  { %18 = vsyncpa [#allocation12], 0 }
   0x8   :  { %19 = vsyncpa [#allocation7], 0 }
   0x9   :  { %21 = vsyncpa [#allocation7 + $0x1], 0  ;;  %s1776_s30 = smov 0   ;;  %s1778_s10 = smov 0  }
   0xa   :  { %s1780_s11 = smov 0   ;;  %s1782_s12 = smov 0  }
   0xb   :  { %s1784_s13 = smov 0   ;;  %s1786_s14 = smov 0  }
   0xc LB: > { %2065 = sst [smem:[#allocation18_spill]] %s1691_s30  ;;  %s1205_s15 = sadd.s32 4294967295, %s1711_s14   ;;  %s1711_s14 = sphi %s1786_s14, %s27_s14   ;;  %s1707_s13 = sphi %s1784_s13, %s2090_s13   ;;  %s1703_s12 = sphi %s1782_s12, %s2089_s12   ;;  %s1699_s11 = sphi %s1780_s11, %s2088_s11   ;;  %s1695_s10 = sphi %s1778_s10, %s2087_s10   ;;  %s1691_s30 = sphi %s1776_s30, %s2086_s30  }
   0xd   : > { %s1206_s16 = sadd.s32 4294967294, %s1711_s14   ;;  %p59_p0 = scmp.ne.s32.totalorder %s1695_s10, %s1691_s30 }
   0xe   : > { %p1810_p1 = scmp.eq.s32.totalorder %s1205_s15, 0  ;;  %p1814_p2 = scmp.eq.s32.totalorder %s1205_s15, 1 }
   0xf   : > { %p259_p3 = scmp.eq.s32.totalorder %s1206_s16, 1  ;;  %p1207_p5 = scmp.ge.s32.totalorder %s1711_s14, 1 }
  0x10   : > { %p1820_p4 = por %p1810_p1, %p59_p0  ;;  %p266_p7 = scmp.lt.s32.totalorder %s1711_s14, 3 }
  0x11   : > { %p1825_p6 = por %p259_p3, %p59_p0  ;;  %s1713_s22 = smov [#allocation8]  }
  0x12   : > { %p1830_p8 = pnand %p1207_p5, %p266_p7  ;;  %s278_s23 = sshll.u32 %s1713_s22, 4  ;;  %s279_s23 = int_to_ptr.vmem [resolvable:$true] %s278_s23 }
  0x13   : > { %s2069_s20 = scalar_select %p1825_p6, 1, 0 }
  0x14   : > { %p1375_p9 = pneg %p1830_p8  ;;  %s1714_s25 = smov [#allocation10]  }
  0x15   : > { %2070 = sst [smem:[#allocation19_spill]] %s2069_s20  ;;  %s294_s26 = sshll.u32 %s1714_s25, 4  ;;  %s295_s26 = int_to_ptr.vmem [resolvable:$true] %s294_s26 }
  0x16   : > { %p1839_p11 = pnand %p1375_p9, %p1810_p1  ;;  %s1528_s27 = scalar_lea.vmem %s279_s23, 1024 }
  0x17   : > { %p1529_p13 = scmp.ne.s32.totalorder %s279_s23, %s1528_s27  ;;  %p1536_p5 = scmp.lt.s32.totalorder %s279_s23, %s279_s23 }
  0x18   : > { %p1519_p12 = pneg %p1839_p11  ;;  %p1537_p7 = scmp.lt.s32.totalorder %s1528_s27, %s1528_s27 }
  0x1a   : > { %p1531_p0 = pnand %p1529_p13, %p1519_p12  ;;  %p1538_p10 = por %p1537_p7, %p1536_p5 }
  0x1c   : > { %p1532_p3 = pneg %p1531_p0 }
  0x1e   : > { %p1539_p9 = pnand %p1538_p10, %p1532_p3 }
  0x20   : > { %1542 = shalt.err (!%p1539_p9)
}
  0x21   : > { %s1715_s28 = smov 64   ;;  %s1716_s29 = smov 4  }
  0x22   : > { %s2073_s1 = sld [smem:[#allocation21_spill]]  ;;  %s1554_s22 = scalar_lea.vmem %s295_s26, 2048 }
  0x23   : > { %p1555_p13 = scmp.ne.s32.totalorder %s295_s26, %s1554_s22  ;;  %p1562_p10 = scmp.lt.s32.totalorder %s295_s26, %s295_s26 }
  0x24   : > { %p1563_p3 = scmp.lt.s32.totalorder %s1554_s22, %s1554_s22 }
  0x25   : > { %p1557_p0 = pnand %p1555_p13, %p1519_p12 }
  0x26   : > { %p1564_p7 = por %p1563_p3, %p1562_p10 }
  0x27   : > { %p1558_p5 = pneg %p1557_p0 }
  0x28   : > { %1378 = dma.hbm_to_vmem [thread:$0]  (!%p1839_p11), %s2073_s1, 1024, %s279_s23, [#allocation9], %s1715_s28, %s1715_s28, %s1716_s29  }
  0x29   : > { %p1565_p9 = pnand %p1564_p7, %p1558_p5 }
  0x2b   : > { %1568 = shalt.err (!%p1565_p9)
}
  0x2c   : > { %s1717_s25 = smov 128   ;;  %s1718_s27 = smov 8  }
  0x2d   : > { %s2074_s3 = sld [smem:[#allocation22_spill]]  ;;  %s1719_s23 = smov [#allocation11]  }
  0x2e   : > { %s310_s15 = sshll.u32 %s1719_s23, 4  ;;  %s311_s15 = int_to_ptr.vmem [resolvable:$true] %s310_s15 }
  0x2f   : > { %s1580_s16 = scalar_lea.vmem %s311_s15, 1024  ;;  %p1588_p5 = scmp.lt.s32.totalorder %s311_s15, %s311_s15 }
  0x30   : > { %p1581_p13 = scmp.ne.s32.totalorder %s311_s15, %s1580_s16  ;;  %p1589_p3 = scmp.lt.s32.totalorder %s1580_s16, %s1580_s16 }
  0x32   : > { %p1583_p0 = pnand %p1581_p13, %p1519_p12  ;;  %p1590_p7 = por %p1589_p3, %p1588_p5 }
  0x33   : > { %1381 = dma.hbm_to_vmem [thread:$0]  (!%p1839_p11), %s2074_s3, 2048, %s295_s26, [#allocation9], %s1717_s25, %s1717_s25, %s1718_s27  }
  0x34   : > { %p1584_p10 = pneg %p1583_p0 }
  0x36   : > { %p1591_p9 = pnand %p1590_p7, %p1584_p10 }
  0x38   : > { %1594 = shalt.err (!%p1591_p9)
}
  0x39   : > { %s2075_s5 = sld [smem:[#allocation23_spill]]  ;;  %s39_s26 = sadd.s32 1, %s1707_s13 }
  0x3a   : > { %p41_p12 = scmp.ge.s32.totalorder %s39_s26, 2  ;;  %s46_s24 = sadd.s32 1, %s1699_s11 }
  0x3b   : > { %p53_p13 = scmp.ne.s32.totalorder %s1699_s11, %s1695_s10  ;;  %p54_p0 = scmp.eq.s32.totalorder %s1711_s14, 0 }
  0x3c   : > { %s2092_s26 = smov (%p41_p12, %s39_s26), 0 }
  0x3d   : > { %2076 = sst [smem:[#allocation20_spill]] %s2092_s26  ;;  %p1882_p10 = por %p54_p0, %p53_p13 }
  0x3e   : > { %p1888_p5 = por %p1814_p2, %p53_p13  ;;  %s43_s27 = ssub.s32 %s1707_s13, %s2092_s26 }
  0x3f   : > { %1384 = dma.hbm_to_vmem [thread:$0]  (!%p1839_p11), %s2075_s5, 1024, %s311_s15, [#allocation12], %s1715_s28, %s1715_s28, %s1716_s29  }
  0x40   : > { %s2078_s25 = scalar_select %p1888_p5, 1, 0 }
  0x41   : > { %p1396_p11 = scmp.lt.s32.totalorder %s1711_s14, 2  ;;  %p44_p3 = scmp.eq.s32.totalorder %s43_s27, 0 }
  0x42   : > { %s333_s28 = sand.u32 1, %s1699_s11   ;;  %s1213_s15 = sshll.u32 %s1707_s13, 7 }
  0x43   : > { %s1212_s29 = sshll.u32 %s333_s28, 3  ;;  %s342_s20 = scalar_lea.hbm %s2048_s0, %s1213_s15 }
  0x44   : > { %s1897_s23 = scalar_select %p44_p3, %s1699_s11, %s46_s24  }
  0x45   : > { %s337_s1 = scalar_lea.vmem [#allocation5], %s1212_s29  ;;  %p1905_p2 = pnand %p1396_p11, %p1882_p10 }
  0x46   : > { %s344_s3 = sshll.u32 %s337_s1, 4  ;;  %s334_s5 = scalar_lea.sflag [#allocation6], %s333_s28  ;;  %s345_s3 = int_to_ptr.vmem [resolvable:$true] %s344_s3 }
  0x47   : > { %p1597_p7 = pneg %p1905_p2  ;;  %s1608_s27 = scalar_lea.vmem %s345_s3, 128 }
  0x48   : > { %p1609_p9 = scmp.ne.s32.totalorder %s345_s3, %s1608_s27  ;;  %s1720_s24 = smov [#allocation5]  }
  0x49   : > { %s1613_s26 = sshll.u32 %s1720_s24, 4  ;;  %s1614_s26 = int_to_ptr.vmem [resolvable:$false] %s1613_s26 }
  0x4a   : > { %p1611_p12 = pnand %p1609_p9, %p1597_p7  ;;  %s1615_s15 = scalar_lea.vmem %s1614_s26, 256 }
  0x4b   : > { %p1616_p0 = scmp.lt.s32.totalorder %s345_s3, %s1614_s26  ;;  %p1617_p3 = scmp.lt.s32.totalorder %s1615_s15, %s1608_s27 }
  0x4c   : > { %p1612_p13 = pneg %p1611_p12 }
  0x4d   : > { %p1618_p6 = por %p1617_p3, %p1616_p0 }
  0x4f   : > { %p1619_p5 = pnand %p1618_p6, %p1612_p13 }
  0x51   : > { %1622 = shalt.err (!%p1619_p5)
}
  0x52   : > { %1388 = dma.hbm_to_vmem [thread:$0]  (!%p1905_p2), %s342_s20, 128, %s345_s3, %s334_s5  }
  0x53   : > { %353 = sbr.rel (%p1830_p8) target bundleno = 1897 (0x769), region = 56  ;;  %s1916_s1 = sand.u32 (!%p1830_p8), 1, %s1695_s10  }
  0x54   : > { %s1215_s22 = sshll.u32 (!%p1830_p8), %s1916_s1, 3  ;;  %s356_s28 = scalar_lea.sflag (!%p1830_p8), [#allocation6], %s1916_s1 }
  0x55   : > { %s1922_s26 = scalar_lea.vmem (!%p1830_p8), [#allocation5], %s1215_s22 }
  0x58   : > { %1674 = dma.done.wait (%p1820_p4), %s356_s28, 128  }
  0x59   : > { %1676 = vsyncadd (%p1820_p4), %s356_s28, 4294967168 }
  0x5a   : > { %1678 = dma.done.wait (%p1810_p1), [#allocation9], 3072  }
  0x5b   : > { %1680 = vsyncadd (%p1810_p1), [#allocation9], 4294964224 }
  0x5c   : > { %1682 = dma.done.wait (%p1810_p1), [#allocation12], 1024  }
  0x5d   : > { %1684 = vsyncadd (%p1810_p1), [#allocation12], 4294966272  ;;  %v1721_v0 = vmov 0.0   ;;  %v1722_v1 = vmov 0   ;;  %vm1723_vm0 = vmmov 0   ;;  %v1466_v6 = vld [vmem:[#allocation8 + $0x38] sm:$0xff]   ;;  %v431_v28 = vlaneseq }
  0x5e   : > { %1295 = vmatprep.subr.bf16.mxu1 %v1721_v0  ;;  %553 = vmatprep.mubr.bf16.mxu0 %v1722_v1  ;;  %v1460_v2 = vld [vmem:[#allocation10 + $0x74] ss:$8 sps:$4 sm:$0xff]   ;;  %v1462_v3 = vld [vmem:[#allocation10 + $0x70] ss:$8 sps:$4 sm:$0xff]   ;;  %v1463_v4 = vld [vmem:[#allocation10 + $0x64] ss:$8 sps:$4 sm:$0xff]  }
  0x5f   : > { %1311 = vmatprep.mubr.msk.bf16.mxu1 %vm1723_vm0, %v1721_v0  ;;  %521 = vmatprep.subr.bf16.mxu0 %v1460_v2  ;;  %v1465_v5 = vld [vmem:[#allocation10 + $0x60] ss:$8 sps:$4 sm:$0xff]   ;;  %v1467_v7 = vld [vmem:[#allocation10 + $0x54] ss:$8 sps:$4 sm:$0xff]   ;;  %v1469_v9 = vld [vmem:[#allocation10 + $0x50] ss:$8 sps:$4 sm:$0xff]  }
  0x60   : > { %522 = vmatpush1.bf16.msra.mxu0 %v1462_v3  ;;  %1296 = vmatpush3.bf16.msra.mxu1 %v1466_v6  ;;  %v1470_v8 = vld [vmem:[#allocation8 + $0x30] sm:$0xff]   ;;  %v1471_v10 = vld [vmem:[#allocation10 + $0x44] ss:$8 sps:$4 sm:$0xff]   ;;  %v1473_v12 = vld [vmem:[#allocation10 + $0x40] ss:$8 sps:$4 sm:$0xff]   ;;  %v432_v29 = vshrl.u32 %v431_v28, 7 }
  0x61   : > { %523 = vmatprep.subr.bf16.mxu0 %v1463_v4  ;;  %1297 = vmatprep.subr.bf16.mxu1 %v1721_v0  ;;  %v1474_v11 = vld [vmem:[#allocation8 + $0x28] sm:$0xff]   ;;  %v1475_v13 = vld [vmem:[#allocation10 + $0x34] ss:$8 sps:$4 sm:$0xff]   ;;  %v1478_v14 = vld [vmem:[#allocation8 + $0x20] sm:$0xff]   ;;  %vm691_vm1 = vcmask 523264   ;;  %s1724_s21 = smov 64  }
  0x62   : > { %v1477_v15 = vld [vmem:[#allocation10 + $0x30] ss:$8 sps:$4 sm:$0xff]   ;;  %v1479_v16 = vld [vmem:[#allocation10 + $0x24] ss:$8 sps:$4 sm:$0xff]   ;;  %v1481_v17 = vld [vmem:[#allocation10 + $0x20] ss:$8 sps:$4 sm:$0xff]  }
  0x63   : > { %v1482_v18 = vld [vmem:[#allocation8 + $0x18] sm:$0xff]   ;;  %v1486_v20 = vld [vmem:[#allocation8 + $0x10] sm:$0xff]   ;;  %v1487_v22 = vld [vmem:[#allocation10 + $0x4] ss:$8 sps:$4 sm:$0xff]   ;;  %v433_v30 = vsub.s32 0, %v432_v29  ;;  %v437_v31 = vsub.s32 1, %v432_v29 }
  0x64   : > { %524 = vmatpush1.bf16.msra.mxu0 %v1465_v5  ;;  %1298 = vmatpush3.bf16.msra.mxu1 %v1470_v8  ;;  %v1483_v19 = vld [vmem:[#allocation10 + $0x14] ss:$8 sps:$4 sm:$0xff]   ;;  %v1485_v21 = vld [vmem:[#allocation10 + $0x10] ss:$8 sps:$4 sm:$0xff]   ;;  %v1490_v23 = vld [vmem:[#allocation8 + $0x8] sm:$0xff]   ;;  %vm758_vm2 = vcmask 1043456  }
  0x65   : > { %525 = vmatprep.subr.bf16.mxu0 %v1467_v7  ;;  %1299 = vmatprep.subr.bf16.mxu1 %v1721_v0  ;;  %v1489_v24 = vld [vmem:[#allocation10] ss:$8 sps:$4 sm:$0xff]   ;;  %v1946_v25 = vld [vmem:[%s1922_s26] sm:$0xff]  ;;  %vm739_vm3 = vcmask 64512   ;;  %s1265_s24 = sshll.u32 %s1703_s12, 7  ;;  %s405_s15 = scalar_lea.vmem [#allocation13], %s1215_s22 }
  0x66   : > { %v1491_v26 = vld [vmem:[#allocation8] sm:$0xff]   ;;  %v412_v27 = vpack.c.bf16 %v1946_v25, %v1946_v25  ;;  %s1095_s28 = sshll.u32 %s405_s15, 4  ;;  %s1093_s5 = scalar_lea.hbm %s2057_s9, %s1265_s24  ;;  %s1096_s28 = int_to_ptr.vmem [resolvable:$true] %s1095_s28 }
  0x67   : > { %v429_v32 = vld [vmem:[%s2052_s4] sm:$0x3]  ;;  %s1081_s17 = scalar_lea.sflag [#allocation7], %s1916_s1  ;;  %s1623_s19 = scalar_lea.vmem %s1096_s28, 128 }
  0x68   : > { %526 = vmatpush1.bf16.msra.mxu0 %v1469_v9  ;;  %1300 = vmatpush3.bf16.msra.mxu1 %v1474_v11  ;;  %v434_v33 = vrot.slane %v429_v32, %v433_v30  ;;  %v438_v34 = vrot.slane %v429_v32, %v437_v31  ;;  %v1237_v36 = vld [vmem:[%s2050_s2] ss:$0 sm:$0xff]  ;;  %p1624_p1 = scmp.ne.s32.totalorder %s1096_s28, %s1623_s19  ;;  %p2080_p4 = scmp.ne.s32.totalorder %s2078_s25, 0 }
  0x69   : > { %527 = vmatprep.subr.bf16.mxu0 %v1471_v10  ;;  %1301 = vmatprep.subr.bf16.mxu1 %v1721_v0 }
  0x6a   : > { %p1625_p6 = pnand %p1624_p1, %p2080_p4 }
  0x6c   : > { %528 = vmatpush1.bf16.msra.mxu0 %v1473_v12  ;;  %1302 = vmatpush3.bf16.msra.mxu1 %v1478_v14  ;;  %p1626_p8 = pneg %p1625_p6 }
  0x6d   : > { %529 = vmatprep.subr.bf16.mxu0 %v1475_v13  ;;  %1303 = vmatprep.subr.bf16.mxu1 %v1721_v0 }
  0x70   : > { %530 = vmatpush1.bf16.msra.mxu0 %v1477_v15  ;;  %1304 = vmatpush3.bf16.msra.mxu1 %v1482_v18 }
  0x71   : > { %531 = vmatprep.subr.bf16.mxu0 %v1479_v16  ;;  %1305 = vmatprep.subr.bf16.mxu1 %v1721_v0 }
  0x74   : > { %532 = vmatpush1.bf16.msra.mxu0 %v1481_v17  ;;  %1306 = vmatpush3.bf16.msra.mxu1 %v1486_v20 }
  0x75   : > { %533 = vmatprep.subr.bf16.mxu0 %v1483_v19  ;;  %1307 = vmatprep.subr.bf16.mxu1 %v1721_v0 }
  0x78   : > { %534 = vmatpush1.bf16.msra.mxu0 %v1485_v21  ;;  %1308 = vmatpush3.bf16.msra.mxu1 %v1490_v23 }
  0x79   : > { %535 = vmatprep.subr.bf16.mxu0 %v1487_v22  ;;  %1309 = vmatprep.subr.bf16.mxu1 %v1721_v0 }
  0x7c   : > { %536 = vmatpush1.bf16.msra.mxu0 %v1489_v24  ;;  %1310 = vmatpush3.bf16.msra.mxu1 %v1491_v26 }
  0x7d   : > { %1339 = vmatprep.subr.bf16.mxu0 %v1721_v0  ;;  %1315 = vmatprep.subr.bf16.mxu1 %v1721_v0 }
  0x7f   : > { %554 = vmatmul.mubr.bf16.vlgmr.msra.gmra.mxu0 %v412_v27  ;;  %1312 = vmatmul.mubr.bf16.vlgmr.msra.gmra.mxu1 %v412_v27 }
  0x80   : > { %1355 = vmatprep.mubr.msk.bf16.mxu0 %vm1723_vm0, %v1721_v0  ;;  %1317 = vmatprep.mubr.msk.bf16.mxu1 %vm1723_vm0, %v1721_v0 }
 0x13f   : > { %v555_v35 = vpop.f32.mrf.mxu0  ;;  %v680_v38 = vpop.f32.mrf.mxu1 }
 0x140   : > { %v556_v39 = vadd.f32 %v555_v35, %v434_v33  ;;  %v681_v41 = vadd.f32 %v1237_v36, %v680_v38  ;;  %v1496_v38 = vld [vmem:[#allocation11 + $0x30] sm:$0xff]  }
 0x141   : > { %v557_v37 = vpop.f32.mrf.mxu0  ;;  %v1313_v43 = vpop.f32.mrf.mxu1 }
 0x142   : > { %v558_v40 = vadd.f32 %v557_v37, %v438_v34  ;;  %v686_v45 = vpack.c.bf16 %v681_v41, %v681_v41  ;;  %v1495_v37 = vld [vmem:[#allocation11 + $0x38] sm:$0xff]  }
 0x143   : > { %v559_v42 = vpop.f32.mrf.mxu0  ;;  %v683_v47 = vpop.f32.mrf.mxu1  ;;  %1340 = vmatpush3.bf16.msra.mxu0 %v1495_v37  ;;  %v1499_v41 = vld [vmem:[#allocation11 + $0x18] sm:$0xff]  }
 0x144   : > { %v1268_v44 = vpack.c.bf16 %v558_v40, %v556_v39  ;;  %687 = vst [vmem:[#allocation3] sm:$0xf] %v686_v45  ;;  %1341 = vmatprep.subr.bf16.mxu0 %v1721_v0  ;;  %v1497_v39 = vld [vmem:[#allocation11 + $0x28] sm:$0xff]   ;;  %v1498_v40 = vld [vmem:[#allocation11 + $0x20] sm:$0xff]  }
 0x145   : > { %v560_v46 = vpop.f32.mrf.mxu0  ;;  %v1314_v48 = vpop.f32.mrf.mxu1 }
 0x146   : > { %570 = vst [vmem:[#allocation2] sm:$0xff] %v1268_v44  ;;  %v1500_v48 = vld [vmem:[#allocation11 + $0x10] sm:$0xff]  }
 0x147   : > { %1342 = vmatpush3.bf16.msra.mxu0 %v1496_v38 }
 0x148   : > { %1343 = vmatprep.subr.bf16.mxu0 %v1721_v0 }
 0x14b   : > { %v688_v50 = vld [vmem:[#allocation3] sm:$0xf]  ;;  %1344 = vmatpush3.bf16.msra.mxu0 %v1497_v39 }
 0x14c   : > { %v1248_v52 = vcombine.low %v688_v50, %v688_v50  ;;  %1345 = vmatprep.subr.bf16.mxu0 %v1721_v0 }
 0x14d   : > { %v689_v49 = vld [vmem:[#allocation2] sm:$0xf]  ;;  %v690_v53 = vld [vmem:[#allocation2 + $0x4] sm:$0xf] }
 0x14e   : > { %v696_v51 = vsel %vm691_vm1, %v689_v49, 0  ;;  %806 = vrot.lane.b32.xlu1 %v1248_v52, %s1724_s21  ;;  %v760_v54 = vsel %vm758_vm2, %v690_v53, 0  ;;  %v1249_v61 = vcombine.low %v689_v49, %v689_v49  ;;  %v1251_v62 = vcombine.low %v690_v53, %v690_v53  ;;  %v1501_v49 = vld [vmem:[#allocation11 + $0x8] sm:$0xff]  }
 0x14f   : > { %1316 = vmatpush3.bf16.xpose.msra.mxu1 %v696_v51  ;;  %1346 = vmatpush3.bf16.msra.mxu0 %v1498_v40 }
 0x150   : > { %1321 = vmatprep.subr.bf16.mxu1 %v1721_v0  ;;  %1347 = vmatprep.subr.bf16.mxu0 %v1721_v0 }
 0x153   : > { %1348 = vmatpush3.bf16.msra.mxu0 %v1499_v41 }
 0x154   : > { %1349 = vmatprep.subr.bf16.mxu0 %v1721_v0 }
 0x156   : > { %1318 = vmatmul.mubr.msk.bf16.vlgmr.msra.gmra.mxu1 %vm691_vm1, %v688_v50  ;;  %v1502_v50 = vld [vmem:[#allocation11] sm:$0xff]  }
 0x157   : > { %1322 = vmatpush3.bf16.msra.mxu1 %v760_v54  ;;  %1323 = vmatprep.mubr.msk.bf16.mxu1 %vm1723_vm0, %v1721_v0 }
 0x158   : > { %1327 = vmatprep.subr.bf16.mxu1 %v1721_v0  ;;  %1350 = vmatpush3.bf16.msra.mxu0 %v1500_v48 }
 0x159   : > { %1351 = vmatprep.subr.bf16.mxu0 %v1721_v0 }
 0x15c   : > { %1352 = vmatpush3.bf16.msra.mxu0 %v1501_v49 }
 0x15d   : > { %1353 = vmatprep.subr.bf16.mxu0 %v1721_v0 }
 0x160   : > { %1354 = vmatpush3.bf16.msra.mxu0 %v1502_v50 }
 0x1c0   : > { %v807_v8 = vpop.permute.xlu1 %806 }
 0x216   : > { %v732_v55 = vpop.f32.mrf.mxu1 }
 0x217   : > { %v738_v56 = vmul.f32 0.125, %v732_v55 }
 0x218   : > { %v1319_v57 = vpop.f32.mrf.mxu1 }
 0x219   : > { %v740_v58 = vsel %vm739_vm3, %v738_v56, -inf }
 0x21a   : > { %741 = vmax.xlane.f32.xlu0 %v740_v58  ;;  %v735_v59 = vpop.f32.mrf.mxu1 }
 0x21c   : > { %v1320_v60 = vpop.f32.mrf.mxu1 }
 0x230   : > { %811 = vrot.lane.b32.xlu0 %v1249_v61, %s1724_s21 }
 0x234   : > { %878 = vrot.lane.b32.xlu0 %v1251_v62, %s1724_s21 }
 0x2a3   : > { %v742_v63 = vpop.xlane.xlu0 %741 }
 0x2a4   : > { %v746_v1 = vsub.f32 %v738_v56, %v742_v63  ;;  %v743_v10 = vsub.f32 -inf, %v742_v63 }
 0x2a6   : > { %v747_v2 = vmul.f32 1.442695, %v746_v1  ;;  %v744_v11 = vmul.f32 1.442695, %v743_v10 }
 0x2a7   : > { %v812_v4 = vpop.permute.xlu0 %811 }
 0x2a8   : > { %1503 = vpow2.f32 %v747_v2  ;;  %v817_v6 = vsel %vm691_vm1, %v812_v4, 0 }
 0x2a9   : > { %1505 = vpow2.f32 %v744_v11 }
 0x2ab   : > { %v879_v7 = vpop.permute.xlu0 %878 }
 0x2ac   : > { %v884_v9 = vsel %vm758_vm2, %v879_v7, 0 }
 0x2b5   : > { %v1504_v3 = vpop.eup %1503 }
 0x2b6   : > { %v754_v5 = vpack.c.bf16 %v1504_v3, %v1504_v3  ;;  %v1506_v12 = vpop.eup %1505  ;;  %v750_v26 = vsel %vm739_vm3, %v1504_v3, 0.0 }
 0x2b7   : > { %v749_v13 = vmul.f32 0.0, %v1506_v12 }
 0x2b8   : > { %1324 = vmatmul.mubr.msk.bf16.vlgmr.msra.gmra.mxu1 %vm739_vm3, %v754_v5 }
 0x2b9   : > { %1328 = vmatpush3.bf16.xpose.msra.mxu1 %v817_v6  ;;  %1329 = vmatprep.mubr.msk.bf16.mxu1 %vm1723_vm0, %v1721_v0 }
 0x2ba   : > { %1333 = vmatprep.subr.bf16.mxu1 %v1721_v0 }
 0x2c0   : > { %1330 = vmatmul.mubr.msk.bf16.vlgmr.msra.gmra.mxu1 %vm691_vm1, %v807_v8 }
 0x2c1   : > { %1334 = vmatpush3.bf16.msra.mxu1 %v884_v9  ;;  %1335 = vmatprep.mubr.msk.bf16.mxu1 %vm1723_vm0, %v1721_v0  ;;  %v1253_v0 = vld [vmem:[%s2054_s6] ss:$0 sm:$0xff] }
 0x378   : > { %v796_v14 = vpop.f32.mrf.mxu1 }
 0x379   : > { %v802_v15 = vadd.f32 %v796_v14, %v749_v13  ;;  %v1263_v14 = vld [vmem:[%s2056_s8] ss:$0 sm:$0xff] }
 0x37a   : > { %v1325_v16 = vpop.f32.mrf.mxu1 }
 0x37c   : > { %v799_v17 = vpop.f32.mrf.mxu1 }
 0x37e   : > { %v1326_v18 = vpop.f32.mrf.mxu1 }
 0x380   : > { %v853_v19 = vpop.f32.mrf.mxu1 }
 0x381   : > { %v859_v20 = vmul.f32 0.125, %v853_v19 }
 0x382   : > { %v1331_v21 = vpop.f32.mrf.mxu1 }
 0x383   : > { %v860_v22 = vsel %vm739_vm3, %v859_v20, -inf }
 0x384   : > { %861 = vmax.xlane.f32.xlu1 %v860_v22  ;;  %v856_v23 = vpop.f32.mrf.mxu1 }
 0x386   : > { %v1332_v24 = vpop.f32.mrf.mxu1 }
 0x388   : > { %751 = vadd.xlane.f32.xlu1 %v750_v26 }
 0x40d   : > { %v862_v27 = vpop.xlane.xlu1 %861 }
 0x40e   : > { %v866_v28 = vsub.f32 %v859_v20, %v862_v27  ;;  %v863_v42 = vsub.f32 -inf, %v862_v27 }
 0x410   : > { %v867_v29 = vmul.f32 1.442695, %v866_v28  ;;  %v864_v43 = vmul.f32 1.442695, %v863_v42 }
 0x411   : > { %v752_v30 = vpop.xlane.xlu1 %751 }
 0x412   : > { %v753_v31 = vadd.f32 %v752_v30, %v749_v13  ;;  %1507 = vpow2.f32 %v867_v29 }
 0x414   : > { %1509 = vrcp.f32 %v753_v31 }
 0x415   : > { %1511 = vpow2.f32 %v864_v43 }
 0x41f   : > { %v1508_v32 = vpop.eup %1507 }
 0x420   : > { %v870_v34 = vsel %vm739_vm3, %v1508_v32, 0.0  ;;  %v874_v35 = vpack.c.bf16 %v1508_v32, %v1508_v32 }
 0x421   : > { %v1510_v33 = vpop.eup %1509  ;;  %871 = vadd.xlane.f32.xlu0 %v870_v34 }
 0x422   : > { %v928_v36 = vmul.f32 %v1510_v33, %v802_v15  ;;  %1336 = vmatmul.mubr.msk.bf16.vlgmr.msra.gmra.mxu1 %vm739_vm3, %v874_v35  ;;  %v1512_v44 = vpop.eup %1511 }
 0x423   : > { %v869_v46 = vmul.f32 0.0, %v1512_v44 }
 0x4aa   : > { %v872_v45 = vpop.xlane.xlu0 %871 }
 0x4ab   : > { %v873_v47 = vadd.f32 %v872_v45, %v869_v46 }
 0x4ad   : > { %1513 = vrcp.f32 %v873_v47 }
 0x4ba   : > { %v1514_v53 = vpop.eup %1513 }
 0x4e2   : > { %v920_v51 = vpop.f32.mrf.mxu1 }
 0x4e3   : > { %v926_v52 = vadd.f32 %v920_v51, %v869_v46 }
 0x4e4   : > { %v1337_v54 = vpop.f32.mrf.mxu1 }
 0x4e5   : > { %v930_v55 = vmul.f32 %v1514_v53, %v926_v52 }
 0x4e6   : > { %v923_v56 = vpop.f32.mrf.mxu1 }
 0x4e7   : > { %932 = vrot.lane.b32.xlu1 %v930_v55, %s1724_s21  ;;  %s1725_s21 = smov [#allocation13]  }
 0x4e8   : > { %v1338_v57 = vpop.f32.mrf.mxu1  ;;  %s1627_s29 = sshll.u32 %s1725_s21, 4  ;;  %s1628_s29 = int_to_ptr.vmem [resolvable:$false] %s1627_s29 }
 0x4e9   : > { %s1629_s12 = scalar_lea.vmem %s1628_s29, 256  ;;  %p1630_p10 = scmp.lt.s32.totalorder %s1096_s28, %s1628_s29 }
 0x4ea   : > { %p1631_p5 = scmp.lt.s32.totalorder %s1629_s12, %s1623_s19 }
 0x4ec   : > { %p1632_p11 = por %p1631_p5, %p1630_p10 }
 0x4ee   : > { %p1633_p2 = pnand %p1632_p11, %p1626_p8 }
 0x559   : > { %v933_v58 = vpop.permute.xlu1 %932 }
 0x55a   : > { %v935_v59 = vsel %vm691_vm1, %v928_v36, %v933_v58 }
 0x55b   : > { %v936_v60 = vpack.c.bf16 %v935_v59, %v935_v59 }
 0x55d   : > { %937 = vst [vmem:[#allocation4] sm:$0xf] %v936_v60 }
 0x564   : > { %v938_v61 = vld [vmem:[#allocation4] sm:$0xf] }
 0x565   : > { %1356 = vmatmul.mubr.bf16.vlgmr.msra.gmra.mxu0 %v938_v61 }
 0x625   : > { %v1044_v62 = vpop.f32.mrf.mxu0 }
 0x626   : > { %v1045_v63 = vadd.f32 %v1253_v0, %v1044_v62 }
 0x627   : > { %v1357_v1 = vpop.f32.mrf.mxu0 }
 0x628   : > { %v1050_v2 = vadd.f32 %v1045_v63, %v1946_v25  ;;  %v1262_v25 = vld [vmem:[%s2055_s7] ss:$0 sm:$0xff] }
 0x629   : > { %v1047_v3 = vpop.f32.mrf.mxu0 }
 0x62a   : > { %1051 = vadd.xlane.f32.xlu0 %v1050_v2 }
 0x62b   : > { %v1358_v4 = vpop.f32.mrf.mxu0 }
 0x6b3   : > { %v1052_v5 = vpop.xlane.xlu0 %1051 }
 0x6b4   : > { %v1054_v6 = vmul.f32 0.0078125, %v1052_v5 }
 0x6b6   : > { %v1055_v7 = vsub.f32 %v1050_v2, %v1054_v6 }
 0x6b8   : > { %v1056_v8 = vmul.f32 %v1055_v7, %v1055_v7 }
 0x6ba   : > { %1057 = vadd.xlane.f32.xlu1 %v1056_v8 }
 0x743   : > { %v1058_v9 = vpop.xlane.xlu1 %1057 }
 0x744   : > { %v1059_v10 = vmul.f32 0.0078125, %v1058_v9 }
 0x746   : > { %v1060_v11 = vadd.f32 1e-12, %v1059_v10 }
 0x748   : > { %1515 = vrsqrt.f32 %v1060_v11 }
 0x755   : > { %v1516_v12 = vpop.eup %1515 }
 0x756   : > { %v1062_v13 = vmul.f32 %v1516_v12, %v1055_v7 }
 0x758   : > { %v1070_v15 = vmul.f32 %v1262_v25, %v1062_v13 }
 0x75a   : > { %v1078_v16 = vadd.f32 %v1263_v14, %v1070_v15 }
 0x75c   : > { %1079 = vst [vmem:[%s405_s15] sm:$0xff] %v1078_v16 }
 0x75d   : > { %1636 = shalt.err (!%p1633_p2)
}
 0x75e   : > { %s1637_s22 = scalar_lea.hbm %s1093_s5, 128  ;;  %s1641_s30 = scalar_lea.hbm %s2057_s9, 256 }
 0x75f   : > { %p1638_p7 = scmp.ne.s32.totalorder %s1093_s5, %s1637_s22  ;;  %p1642_p13 = scmp.lt.s32.totalorder %s1093_s5, %s2057_s9 }
 0x760   : > { %p1643_p0 = scmp.lt.s32.totalorder %s1641_s30, %s1637_s22 }
 0x761   : > { %p1639_p9 = pnand %p1638_p7, %p2080_p4 }
 0x762   : > { %p1644_p3 = por %p1643_p0, %p1642_p13 }
 0x763   : > { %p1640_p12 = pneg %p1639_p9 }
 0x765   : > { %p1645_p1 = pnand %p1644_p3, %p1640_p12 }
 0x767   : > { %1648 = shalt.err (!%p1645_p1)
}
 0x768   : > { %1373 = dma.vmem_to_hbm [thread:$0]  (%p2080_p4), %s1096_s28, 128, %s1093_s5, %s1081_s17  }
 0x769 PF: > { %s2081_s27 = sld [smem:[#allocation18_spill]]  ;;  %p2084_p8 = scmp.ge.s32.totalorder %s1711_s14, 2 }
 0x76a   : > { %s2082_s24 = sld [smem:[#allocation19_spill]] }
 0x76f   : > { %s1107_s15 = sand.u32 1, %s2081_s27  }
 0x770   : > { %p2083_p6 = scmp.ne.s32.totalorder %s2082_s24, 0  ;;  %s1108_s26 = scalar_lea.sflag [#allocation7], %s1107_s15 }
 0x772   : > { %p1390_p10 = pnand %p2084_p8, %p2083_p6 }
 0x774   : > { %p1391_p5 = pneg %p1390_p10 }
 0x776   : > { %1686 = dma.done.wait (%p1391_p5), %s1108_s26, 128  }
 0x777   : > { %1688 = vsyncadd (%p1391_p5), %s1108_s26, 4294967168  ;;  %s27_s14 = sadd.s32 1, %s1711_s14   ;;  %s2085_s25 = sld [smem:[#allocation20_spill]] }
 0x778   : > { %p24_p11 = scmp.ge.s32.totalorder %s27_s14, 4   ;;  %s2086_s30 = smov %s1695_s10 }
 0x779   : > { %s2087_s10 = smov %s1699_s11  ;;  %s2088_s11 = smov %s1897_s23 }
 0x77a   : > { %s2089_s12 = smov %s1707_s13  ;;  %26 = sbr.rel (!%p24_p11) target bundleno = 12 (0xc), region = 118 }
 0x77d   : > { %s2090_s13 = smov %s2085_s25 }
 0x77f   :  { %1113 = vsyncpa [#allocation6], 1 }
 0x780   :  { %1115 = vsyncpa [#allocation6 + $0x1], 1 }
 0x781   :  { %1116 = vsyncpa [#allocation9], 1 }
 0x782   :  { %1117 = vsyncpa [#allocation12], 1 }
 0x783   :  { %1118 = vsyncpa [#allocation7], 1 }
 0x784   :  { %1120 = vsyncpa [#allocation7 + $0x1], 1 }

// kernel: tpu_custom_call.1
= control target key start
LH: loop header
LB: loop body
LE: loop exit
PB: predicated region body
PF: predicated region fallthrough
CT: control target
= control target key end

     0   :  { %s2048_s0 = inlined_call_operand.hbm [shape: f32[2,8,128], index: 0, kind: input, shape index: {}]   ;;  %s2049_s1 = inlined_call_operand.hbm [shape: bf16[128,128], index: 1, kind: input, shape index: {}]   ;;  %s2050_s2 = inlined_call_operand.vmem [shape: f32[1,128], index: 2, kind: input, shape index: {}]   ;;  %s2051_s3 = inlined_call_operand.hbm [shape: bf16[128,256], index: 3, kind: input, shape index: {}]   ;;  %s2052_s4 = inlined_call_operand.vmem [shape: f32[1,256], index: 4, kind: input, shape index: {}]   ;;  %s2053_s5 = inlined_call_operand.hbm [shape: bf16[128,128], index: 5, kind: input, shape index: {}]   ;;  %s2054_s6 = inlined_call_operand.vmem [shape: f32[1,128], index: 6, kind: input, shape index: {}]   ;;  %s2055_s7 = inlined_call_operand.vmem [shape: f32[1,128], index: 7, kind: input, shape index: {}]   ;;  %s2056_s8 = inlined_call_operand.vmem [shape: f32[1,128], index: 8, kind: input, shape index: {}]   ;;  %s2057_s9 = inlined_call_operand.hbm [shape: f32[2,8,128], index: 9, kind: output, shape index: {}]  }
   0x1   :  { %2062 = sst [smem:[#allocation21_spill]] %s2049_s1 }
   0x2   :  { %2063 = sst [smem:[#allocation22_spill]] %s2051_s3 }
   0x3   :  { %2064 = sst [smem:[#allocation23_spill]] %s2053_s5 }
   0x4   :  { %14 = vsyncpa [#allocation6], 0 }
   0x5   :  { %16 = vsyncpa [#allocation6 + $0x1], 0 }
   0x6   :  { %17 = vsyncpa [#allocation9], 0 }
   0x7   :  { %18 = vsyncpa [#allocation12], 0 }
   0x8   :  { %19 = vsyncpa [#allocation7], 0 }
   0x9   :  { %21 = vsyncpa [#allocation7 + $0x1], 0  ;;  %s1776_s30 = smov 0   ;;  %s1778_s10 = smov 0  }
   0xa   :  { %s1780_s11 = smov 0   ;;  %s1782_s12 = smov 0  }
   0xb   :  { %s1784_s13 = smov 0   ;;  %s1786_s14 = smov 0  }
   0xc LB: > { %2065 = sst [smem:[#allocation18_spill]] %s1691_s30  ;;  %s1205_s15 = sadd.s32 4294967295, %s1711_s14   ;;  %s1711_s14 = sphi %s1786_s14, %s27_s14   ;;  %s1707_s13 = sphi %s1784_s13, %s2090_s13   ;;  %s1703_s12 = sphi %s1782_s12, %s2089_s12   ;;  %s1699_s11 = sphi %s1780_s11, %s2088_s11   ;;  %s1695_s10 = sphi %s1778_s10, %s2087_s10   ;;  %s1691_s30 = sphi %s1776_s30, %s2086_s30  }
   0xd   : > { %s1206_s16 = sadd.s32 4294967294, %s1711_s14   ;;  %p59_p0 = scmp.ne.s32.totalorder %s1695_s10, %s1691_s30 }
   0xe   : > { %p1810_p1 = scmp.eq.s32.totalorder %s1205_s15, 0  ;;  %p1814_p2 = scmp.eq.s32.totalorder %s1205_s15, 1 }
   0xf   : > { %p259_p3 = scmp.eq.s32.totalorder %s1206_s16, 1  ;;  %p1207_p5 = scmp.ge.s32.totalorder %s1711_s14, 1 }
  0x10   : > { %p1820_p4 = por %p1810_p1, %p59_p0  ;;  %p266_p7 = scmp.lt.s32.totalorder %s1711_s14, 3 }
  0x11   : > { %p1825_p6 = por %p259_p3, %p59_p0  ;;  %s1713_s22 = smov [#allocation8]  }
  0x12   : > { %p1830_p8 = pnand %p1207_p5, %p266_p7  ;;  %s278_s23 = sshll.u32 %s1713_s22, 4  ;;  %s279_s23 = int_to_ptr.vmem [resolvable:$true] %s278_s23 }
  0x13   : > { %s2069_s20 = scalar_select %p1825_p6, 1, 0 }
  0x14   : > { %p1375_p9 = pneg %p1830_p8  ;;  %s1714_s25 = smov [#allocation10]  }
  0x15   : > { %2070 = sst [smem:[#allocation19_spill]] %s2069_s20  ;;  %s294_s26 = sshll.u32 %s1714_s25, 4  ;;  %s295_s26 = int_to_ptr.vmem [resolvable:$true] %s294_s26 }
  0x16   : > { %p1839_p11 = pnand %p1375_p9, %p1810_p1  ;;  %s1528_s27 = scalar_lea.vmem %s279_s23, 1024 }
  0x17   : > { %p1529_p13 = scmp.ne.s32.totalorder %s279_s23, %s1528_s27  ;;  %p1536_p5 = scmp.lt.s32.totalorder %s279_s23, %s279_s23 }
  0x18   : > { %p1519_p12 = pneg %p1839_p11  ;;  %p1537_p7 = scmp.lt.s32.totalorder %s1528_s27, %s1528_s27 }
  0x1a   : > { %p1531_p0 = pnand %p1529_p13, %p1519_p12  ;;  %p1538_p10 = por %p1537_p7, %p1536_p5 }
  0x1c   : > { %p1532_p3 = pneg %p1531_p0 }
  0x1e   : > { %p1539_p9 = pnand %p1538_p10, %p1532_p3 }
  0x20   : > { %1542 = shalt.err (!%p1539_p9)
}
  0x21   : > { %s1715_s28 = smov 64   ;;  %s1716_s29 = smov 4  }
  0x22   : > { %s2073_s1 = sld [smem:[#allocation21_spill]]  ;;  %s1554_s22 = scalar_lea.vmem %s295_s26, 2048 }
  0x23   : > { %p1555_p13 = scmp.ne.s32.totalorder %s295_s26, %s1554_s22  ;;  %p1562_p10 = scmp.lt.s32.totalorder %s295_s26, %s295_s26 }
  0x24   : > { %p1563_p3 = scmp.lt.s32.totalorder %s1554_s22, %s1554_s22 }
  0x25   : > { %p1557_p0 = pnand %p1555_p13, %p1519_p12 }
  0x26   : > { %p1564_p7 = por %p1563_p3, %p1562_p10 }
  0x27   : > { %p1558_p5 = pneg %p1557_p0 }
  0x28   : > { %1378 = dma.hbm_to_vmem [thread:$0]  (!%p1839_p11), %s2073_s1, 1024, %s279_s23, [#allocation9], %s1715_s28, %s1715_s28, %s1716_s29  }
  0x29   : > { %p1565_p9 = pnand %p1564_p7, %p1558_p5 }
  0x2b   : > { %1568 = shalt.err (!%p1565_p9)
}
  0x2c   : > { %s1717_s25 = smov 128   ;;  %s1718_s27 = smov 8  }
  0x2d   : > { %s2074_s3 = sld [smem:[#allocation22_spill]]  ;;  %s1719_s23 = smov [#allocation11]  }
  0x2e   : > { %s310_s15 = sshll.u32 %s1719_s23, 4  ;;  %s311_s15 = int_to_ptr.vmem [resolvable:$true] %s310_s15 }
  0x2f   : > { %s1580_s16 = scalar_lea.vmem %s311_s15, 1024  ;;  %p1588_p5 = scmp.lt.s32.totalorder %s311_s15, %s311_s15 }
  0x30   : > { %p1581_p13 = scmp.ne.s32.totalorder %s311_s15, %s1580_s16  ;;  %p1589_p3 = scmp.lt.s32.totalorder %s1580_s16, %s1580_s16 }
  0x32   : > { %p1583_p0 = pnand %p1581_p13, %p1519_p12  ;;  %p1590_p7 = por %p1589_p3, %p1588_p5 }
  0x33   : > { %1381 = dma.hbm_to_vmem [thread:$0]  (!%p1839_p11), %s2074_s3, 2048, %s295_s26, [#allocation9], %s1717_s25, %s1717_s25, %s1718_s27  }
  0x34   : > { %p1584_p10 = pneg %p1583_p0 }
  0x36   : > { %p1591_p9 = pnand %p1590_p7, %p1584_p10 }
  0x38   : > { %1594 = shalt.err (!%p1591_p9)
}
  0x39   : > { %s2075_s5 = sld [smem:[#allocation23_spill]]  ;;  %s39_s26 = sadd.s32 1, %s1707_s13 }
  0x3a   : > { %p41_p12 = scmp.ge.s32.totalorder %s39_s26, 2  ;;  %s46_s24 = sadd.s32 1, %s1699_s11 }
  0x3b   : > { %p53_p13 = scmp.ne.s32.totalorder %s1699_s11, %s1695_s10  ;;  %p54_p0 = scmp.eq.s32.totalorder %s1711_s14, 0 }
  0x3c   : > { %s2092_s26 = smov (%p41_p12, %s39_s26), 0 }
  0x3d   : > { %2076 = sst [smem:[#allocation20_spill]] %s2092_s26  ;;  %p1882_p10 = por %p54_p0, %p53_p13 }
  0x3e   : > { %p1888_p5 = por %p1814_p2, %p53_p13  ;;  %s43_s27 = ssub.s32 %s1707_s13, %s2092_s26 }
  0x3f   : > { %1384 = dma.hbm_to_vmem [thread:$0]  (!%p1839_p11), %s2075_s5, 1024, %s311_s15, [#allocation12], %s1715_s28, %s1715_s28, %s1716_s29  }
  0x40   : > { %s2078_s25 = scalar_select %p1888_p5, 1, 0 }
  0x41   : > { %p1396_p11 = scmp.lt.s32.totalorder %s1711_s14, 2  ;;  %p44_p3 = scmp.eq.s32.totalorder %s43_s27, 0 }
  0x42   : > { %s333_s28 = sand.u32 1, %s1699_s11   ;;  %s1213_s15 = sshll.u32 %s1707_s13, 7 }
  0x43   : > { %s1212_s29 = sshll.u32 %s333_s28, 3  ;;  %s342_s20 = scalar_lea.hbm %s2048_s0, %s1213_s15 }
  0x44   : > { %s1897_s23 = scalar_select %p44_p3, %s1699_s11, %s46_s24  }
  0x45   : > { %s337_s1 = scalar_lea.vmem [#allocation5], %s1212_s29  ;;  %p1905_p2 = pnand %p1396_p11, %p1882_p10 }
  0x46   : > { %s344_s3 = sshll.u32 %s337_s1, 4  ;;  %s334_s5 = scalar_lea.sflag [#allocation6], %s333_s28  ;;  %s345_s3 = int_to_ptr.vmem [resolvable:$true] %s344_s3 }
  0x47   : > { %p1597_p7 = pneg %p1905_p2  ;;  %s1608_s27 = scalar_lea.vmem %s345_s3, 128 }
  0x48   : > { %p1609_p9 = scmp.ne.s32.totalorder %s345_s3, %s1608_s27  ;;  %s1720_s24 = smov [#allocation5]  }
  0x49   : > { %s1613_s26 = sshll.u32 %s1720_s24, 4  ;;  %s1614_s26 = int_to_ptr.vmem [resolvable:$false] %s1613_s26 }
  0x4a   : > { %p1611_p12 = pnand %p1609_p9, %p1597_p7  ;;  %s1615_s15 = scalar_lea.vmem %s1614_s26, 256 }
  0x4b   : > { %p1616_p0 = scmp.lt.s32.totalorder %s345_s3, %s1614_s26  ;;  %p1617_p3 = scmp.lt.s32.totalorder %s1615_s15, %s1608_s27 }
  0x4c   : > { %p1612_p13 = pneg %p1611_p12 }
  0x4d   : > { %p1618_p6 = por %p1617_p3, %p1616_p0 }
  0x4f   : > { %p1619_p5 = pnand %p1618_p6, %p1612_p13 }
  0x51   : > { %1622 = shalt.err (!%p1619_p5)
}
  0x52   : > { %1388 = dma.hbm_to_vmem [thread:$0]  (!%p1905_p2), %s342_s20, 128, %s345_s3, %s334_s5  }
  0x53   : > { %353 = sbr.rel (%p1830_p8) target bundleno = 1897 (0x769), region = 56  ;;  %s1916_s1 = sand.u32 (!%p1830_p8), 1, %s1695_s10  }
  0x54   : > { %s1215_s22 = sshll.u32 (!%p1830_p8), %s1916_s1, 3  ;;  %s356_s28 = scalar_lea.sflag (!%p1830_p8), [#allocation6], %s1916_s1 }
  0x55   : > { %s1922_s26 = scalar_lea.vmem (!%p1830_p8), [#allocation5], %s1215_s22 }
  0x58   : > { %1674 = dma.done.wait (%p1820_p4), %s356_s28, 128  }
  0x59   : > { %1676 = vsyncadd (%p1820_p4), %s356_s28, 4294967168 }
  0x5a   : > { %1678 = dma.done.wait (%p1810_p1), [#allocation9], 3072  }
  0x5b   : > { %1680 = vsyncadd (%p1810_p1), [#allocation9], 4294964224 }
  0x5c   : > { %1682 = dma.done.wait (%p1810_p1), [#allocation12], 1024  }
  0x5d   : > { %1684 = vsyncadd (%p1810_p1), [#allocation12], 4294966272  ;;  %v1721_v0 = vmov 0.0   ;;  %v1722_v1 = vmov 0   ;;  %vm1723_vm0 = vmmov 0   ;;  %v1466_v6 = vld [vmem:[#allocation8 + $0x38] sm:$0xff]   ;;  %v431_v28 = vlaneseq }
  0x5e   : > { %1295 = vmatprep.subr.bf16.mxu1 %v1721_v0  ;;  %553 = vmatprep.mubr.bf16.mxu0 %v1722_v1  ;;  %v1460_v2 = vld [vmem:[#allocation10 + $0x74] ss:$8 sps:$4 sm:$0xff]   ;;  %v1462_v3 = vld [vmem:[#allocation10 + $0x70] ss:$8 sps:$4 sm:$0xff]   ;;  %v1463_v4 = vld [vmem:[#allocation10 + $0x64] ss:$8 sps:$4 sm:$0xff]  }
  0x5f   : > { %1311 = vmatprep.mubr.msk.bf16.mxu1 %vm1723_vm0, %v1721_v0  ;;  %521 = vmatprep.subr.bf16.mxu0 %v1460_v2  ;;  %v1465_v5 = vld [vmem:[#allocation10 + $0x60] ss:$8 sps:$4 sm:$0xff]   ;;  %v1467_v7 = vld [vmem:[#allocation10 + $0x54] ss:$8 sps:$4 sm:$0xff]   ;;  %v1469_v9 = vld [vmem:[#allocation10 + $0x50] ss:$8 sps:$4 sm:$0xff]  }
  0x60   : > { %522 = vmatpush1.bf16.msra.mxu0 %v1462_v3  ;;  %1296 = vmatpush3.bf16.msra.mxu1 %v1466_v6  ;;  %v1470_v8 = vld [vmem:[#allocation8 + $0x30] sm:$0xff]   ;;  %v1471_v10 = vld [vmem:[#allocation10 + $0x44] ss:$8 sps:$4 sm:$0xff]   ;;  %v1473_v12 = vld [vmem:[#allocation10 + $0x40] ss:$8 sps:$4 sm:$0xff]   ;;  %v432_v29 = vshrl.u32 %v431_v28, 7 }
  0x61   : > { %523 = vmatprep.subr.bf16.mxu0 %v1463_v4  ;;  %1297 = vmatprep.subr.bf16.mxu1 %v1721_v0  ;;  %v1474_v11 = vld [vmem:[#allocation8 + $0x28] sm:$0xff]   ;;  %v1475_v13 = vld [vmem:[#allocation10 + $0x34] ss:$8 sps:$4 sm:$0xff]   ;;  %v1478_v14 = vld [vmem:[#allocation8 + $0x20] sm:$0xff]   ;;  %vm691_vm1 = vcmask 523264   ;;  %s1724_s21 = smov 64  }
  0x62   : > { %v1477_v15 = vld [vmem:[#allocation10 + $0x30] ss:$8 sps:$4 sm:$0xff]   ;;  %v1479_v16 = vld [vmem:[#allocation10 + $0x24] ss:$8 sps:$4 sm:$0xff]   ;;  %v1481_v17 = vld [vmem:[#allocation10 + $0x20] ss:$8 sps:$4 sm:$0xff]  }
  0x63   : > { %v1482_v18 = vld [vmem:[#allocation8 + $0x18] sm:$0xff]   ;;  %v1486_v20 = vld [vmem:[#allocation8 + $0x10] sm:$0xff]   ;;  %v1487_v22 = vld [vmem:[#allocation10 + $0x4] ss:$8 sps:$4 sm:$0xff]   ;;  %v433_v30 = vsub.s32 0, %v432_v29  ;;  %v437_v31 = vsub.s32 1, %v432_v29 }
  0x64   : > { %524 = vmatpush1.bf16.msra.mxu0 %v1465_v5  ;;  %1298 = vmatpush3.bf16.msra.mxu1 %v1470_v8  ;;  %v1483_v19 = vld [vmem:[#allocation10 + $0x14] ss:$8 sps:$4 sm:$0xff]   ;;  %v1485_v21 = vld [vmem:[#allocation10 + $0x10] ss:$8 sps:$4 sm:$0xff]   ;;  %v1490_v23 = vld [vmem:[#allocation8 + $0x8] sm:$0xff]   ;;  %vm758_vm2 = vcmask 1043456  }
  0x65   : > { %525 = vmatprep.subr.bf16.mxu0 %v1467_v7  ;;  %1299 = vmatprep.subr.bf16.mxu1 %v1721_v0  ;;  %v1489_v24 = vld [vmem:[#allocation10] ss:$8 sps:$4 sm:$0xff]   ;;  %v1946_v25 = vld [vmem:[%s1922_s26] sm:$0xff]  ;;  %vm739_vm3 = vcmask 64512   ;;  %s1265_s24 = sshll.u32 %s1703_s12, 7  ;;  %s405_s15 = scalar_lea.vmem [#allocation13], %s1215_s22 }
  0x66   : > { %v1491_v26 = vld [vmem:[#allocation8] sm:$0xff]   ;;  %v412_v27 = vpack.c.bf16 %v1946_v25, %v1946_v25  ;;  %s1095_s28 = sshll.u32 %s405_s15, 4  ;;  %s1093_s5 = scalar_lea.hbm %s2057_s9, %s1265_s24  ;;  %s1096_s28 = int_to_ptr.vmem [resolvable:$true] %s1095_s28 }
  0x67   : > { %v429_v32 = vld [vmem:[%s2052_s4] sm:$0x3]  ;;  %s1081_s17 = scalar_lea.sflag [#allocation7], %s1916_s1  ;;  %s1623_s19 = scalar_lea.vmem %s1096_s28, 128 }
  0x68   : > { %526 = vmatpush1.bf16.msra.mxu0 %v1469_v9  ;;  %1300 = vmatpush3.bf16.msra.mxu1 %v1474_v11  ;;  %v434_v33 = vrot.slane %v429_v32, %v433_v30  ;;  %v438_v34 = vrot.slane %v429_v32, %v437_v31  ;;  %v1237_v36 = vld [vmem:[%s2050_s2] ss:$0 sm:$0xff]  ;;  %p1624_p1 = scmp.ne.s32.totalorder %s1096_s28, %s1623_s19  ;;  %p2080_p4 = scmp.ne.s32.totalorder %s2078_s25, 0 }
  0x69   : > { %527 = vmatprep.subr.bf16.mxu0 %v1471_v10  ;;  %1301 = vmatprep.subr.bf16.mxu1 %v1721_v0 }
  0x6a   : > { %p1625_p6 = pnand %p1624_p1, %p2080_p4 }
  0x6c   : > { %528 = vmatpush1.bf16.msra.mxu0 %v1473_v12  ;;  %1302 = vmatpush3.bf16.msra.mxu1 %v1478_v14  ;;  %p1626_p8 = pneg %p1625_p6 }
  0x6d   : > { %529 = vmatprep.subr.bf16.mxu0 %v1475_v13  ;;  %1303 = vmatprep.subr.bf16.mxu1 %v1721_v0 }
  0x70   : > { %530 = vmatpush1.bf16.msra.mxu0 %v1477_v15  ;;  %1304 = vmatpush3.bf16.msra.mxu1 %v1482_v18 }
  0x71   : > { %531 = vmatprep.subr.bf16.mxu0 %v1479_v16  ;;  %1305 = vmatprep.subr.bf16.mxu1 %v1721_v0 }
  0x74   : > { %532 = vmatpush1.bf16.msra.mxu0 %v1481_v17  ;;  %1306 = vmatpush3.bf16.msra.mxu1 %v1486_v20 }
  0x75   : > { %533 = vmatprep.subr.bf16.mxu0 %v1483_v19  ;;  %1307 = vmatprep.subr.bf16.mxu1 %v1721_v0 }
  0x78   : > { %534 = vmatpush1.bf16.msra.mxu0 %v1485_v21  ;;  %1308 = vmatpush3.bf16.msra.mxu1 %v1490_v23 }
  0x79   : > { %535 = vmatprep.subr.bf16.mxu0 %v1487_v22  ;;  %1309 = vmatprep.subr.bf16.mxu1 %v1721_v0 }
  0x7c   : > { %536 = vmatpush1.bf16.msra.mxu0 %v1489_v24  ;;  %1310 = vmatpush3.bf16.msra.mxu1 %v1491_v26 }
  0x7d   : > { %1339 = vmatprep.subr.bf16.mxu0 %v1721_v0  ;;  %1315 = vmatprep.subr.bf16.mxu1 %v1721_v0 }
  0x7f   : > { %554 = vmatmul.mubr.bf16.vlgmr.msra.gmra.mxu0 %v412_v27  ;;  %1312 = vmatmul.mubr.bf16.vlgmr.msra.gmra.mxu1 %v412_v27 }
  0x80   : > { %1355 = vmatprep.mubr.msk.bf16.mxu0 %vm1723_vm0, %v1721_v0  ;;  %1317 = vmatprep.mubr.msk.bf16.mxu1 %vm1723_vm0, %v1721_v0 }
 0x13f   : > { %v555_v35 = vpop.f32.mrf.mxu0  ;;  %v680_v38 = vpop.f32.mrf.mxu1 }
 0x140   : > { %v556_v39 = vadd.f32 %v555_v35, %v434_v33  ;;  %v681_v41 = vadd.f32 %v1237_v36, %v680_v38  ;;  %v1496_v38 = vld [vmem:[#allocation11 + $0x30] sm:$0xff]  }
 0x141   : > { %v557_v37 = vpop.f32.mrf.mxu0  ;;  %v1313_v43 = vpop.f32.mrf.mxu1 }
 0x142   : > { %v558_v40 = vadd.f32 %v557_v37, %v438_v34  ;;  %v686_v45 = vpack.c.bf16 %v681_v41, %v681_v41  ;;  %v1495_v37 = vld [vmem:[#allocation11 + $0x38] sm:$0xff]  }
 0x143   : > { %v559_v42 = vpop.f32.mrf.mxu0  ;;  %v683_v47 = vpop.f32.mrf.mxu1  ;;  %1340 = vmatpush3.bf16.msra.mxu0 %v1495_v37  ;;  %v1499_v41 = vld [vmem:[#allocation11 + $0x18] sm:$0xff]  }
 0x144   : > { %v1268_v44 = vpack.c.bf16 %v558_v40, %v556_v39  ;;  %687 = vst [vmem:[#allocation3] sm:$0xf] %v686_v45  ;;  %1341 = vmatprep.subr.bf16.mxu0 %v1721_v0  ;;  %v1497_v39 = vld [vmem:[#allocation11 + $0x28] sm:$0xff]   ;;  %v1498_v40 = vld [vmem:[#allocation11 + $0x20] sm:$0xff]  }
 0x145   : > { %v560_v46 = vpop.f32.mrf.mxu0  ;;  %v1314_v48 = vpop.f32.mrf.mxu1 }
 0x146   : > { %570 = vst [vmem:[#allocation2] sm:$0xff] %v1268_v44  ;;  %v1500_v48 = vld [vmem:[#allocation11 + $0x10] sm:$0xff]  }
 0x147   : > { %1342 = vmatpush3.bf16.msra.mxu0 %v1496_v38 }
 0x148   : > { %1343 = vmatprep.subr.bf16.mxu0 %v1721_v0 }
 0x14b   : > { %v688_v50 = vld [vmem:[#allocation3] sm:$0xf]  ;;  %1344 = vmatpush3.bf16.msra.mxu0 %v1497_v39 }
 0x14c   : > { %v1248_v52 = vcombine.low %v688_v50, %v688_v50  ;;  %1345 = vmatprep.subr.bf16.mxu0 %v1721_v0 }
 0x14d   : > { %v689_v49 = vld [vmem:[#allocation2] sm:$0xf]  ;;  %v690_v53 = vld [vmem:[#allocation2 + $0x4] sm:$0xf] }
 0x14e   : > { %v696_v51 = vsel %vm691_vm1, %v689_v49, 0  ;;  %806 = vrot.lane.b32.xlu1 %v1248_v52, %s1724_s21  ;;  %v760_v54 = vsel %vm758_vm2, %v690_v53, 0  ;;  %v1249_v61 = vcombine.low %v689_v49, %v689_v49  ;;  %v1251_v62 = vcombine.low %v690_v53, %v690_v53  ;;  %v1501_v49 = vld [vmem:[#allocation11 + $0x8] sm:$0xff]  }
 0x14f   : > { %1316 = vmatpush3.bf16.xpose.msra.mxu1 %v696_v51  ;;  %1346 = vmatpush3.bf16.msra.mxu0 %v1498_v40 }
 0x150   : > { %1321 = vmatprep.subr.bf16.mxu1 %v1721_v0  ;;  %1347 = vmatprep.subr.bf16.mxu0 %v1721_v0 }
 0x153   : > { %1348 = vmatpush3.bf16.msra.mxu0 %v1499_v41 }
 0x154   : > { %1349 = vmatprep.subr.bf16.mxu0 %v1721_v0 }
 0x156   : > { %1318 = vmatmul.mubr.msk.bf16.vlgmr.msra.gmra.mxu1 %vm691_vm1, %v688_v50  ;;  %v1502_v50 = vld [vmem:[#allocation11] sm:$0xff]  }
 0x157   : > { %1322 = vmatpush3.bf16.msra.mxu1 %v760_v54  ;;  %1323 = vmatprep.mubr.msk.bf16.mxu1 %vm1723_vm0, %v1721_v0 }
 0x158   : > { %1327 = vmatprep.subr.bf16.mxu1 %v1721_v0  ;;  %1350 = vmatpush3.bf16.msra.mxu0 %v1500_v48 }
 0x159   : > { %1351 = vmatprep.subr.bf16.mxu0 %v1721_v0 }
 0x15c   : > { %1352 = vmatpush3.bf16.msra.mxu0 %v1501_v49 }
 0x15d   : > { %1353 = vmatprep.subr.bf16.mxu0 %v1721_v0 }
 0x160   : > { %1354 = vmatpush3.bf16.msra.mxu0 %v1502_v50 }
 0x1c0   : > { %v807_v8 = vpop.permute.xlu1 %806 }
 0x216   : > { %v732_v55 = vpop.f32.mrf.mxu1 }
 0x217   : > { %v738_v56 = vmul.f32 0.125, %v732_v55 }
 0x218   : > { %v1319_v57 = vpop.f32.mrf.mxu1 }
 0x219   : > { %v740_v58 = vsel %vm739_vm3, %v738_v56, -inf }
 0x21a   : > { %741 = vmax.xlane.f32.xlu0 %v740_v58  ;;  %v735_v59 = vpop.f32.mrf.mxu1 }
 0x21c   : > { %v1320_v60 = vpop.f32.mrf.mxu1 }
 0x230   : > { %811 = vrot.lane.b32.xlu0 %v1249_v61, %s1724_s21 }
 0x234   : > { %878 = vrot.lane.b32.xlu0 %v1251_v62, %s1724_s21 }
 0x2a3   : > { %v742_v63 = vpop.xlane.xlu0 %741 }
 0x2a4   : > { %v746_v1 = vsub.f32 %v738_v56, %v742_v63  ;;  %v743_v10 = vsub.f32 -inf, %v742_v63 }
 0x2a6   : > { %v747_v2 = vmul.f32 1.442695, %v746_v1  ;;  %v744_v11 = vmul.f32 1.442695, %v743_v10 }
 0x2a7   : > { %v812_v4 = vpop.permute.xlu0 %811 }
 0x2a8   : > { %1503 = vpow2.f32 %v747_v2  ;;  %v817_v6 = vsel %vm691_vm1, %v812_v4, 0 }
 0x2a9   : > { %1505 = vpow2.f32 %v744_v11 }
 0x2ab   : > { %v879_v7 = vpop.permute.xlu0 %878 }
 0x2ac   : > { %v884_v9 = vsel %vm758_vm2, %v879_v7, 0 }
 0x2b5   : > { %v1504_v3 = vpop.eup %1503 }
 0x2b6   : > { %v754_v5 = vpack.c.bf16 %v1504_v3, %v1504_v3  ;;  %v1506_v12 = vpop.eup %1505  ;;  %v750_v26 = vsel %vm739_vm3, %v1504_v3, 0.0 }
 0x2b7   : > { %v749_v13 = vmul.f32 0.0, %v1506_v12 }
 0x2b8   : > { %1324 = vmatmul.mubr.msk.bf16.vlgmr.msra.gmra.mxu1 %vm739_vm3, %v754_v5 }
 0x2b9   : > { %1328 = vmatpush3.bf16.xpose.msra.mxu1 %v817_v6  ;;  %1329 = vmatprep.mubr.msk.bf16.mxu1 %vm1723_vm0, %v1721_v0 }
 0x2ba   : > { %1333 = vmatprep.subr.bf16.mxu1 %v1721_v0 }
 0x2c0   : > { %1330 = vmatmul.mubr.msk.bf16.vlgmr.msra.gmra.mxu1 %vm691_vm1, %v807_v8 }
 0x2c1   : > { %1334 = vmatpush3.bf16.msra.mxu1 %v884_v9  ;;  %1335 = vmatprep.mubr.msk.bf16.mxu1 %vm1723_vm0, %v1721_v0  ;;  %v1253_v0 = vld [vmem:[%s2054_s6] ss:$0 sm:$0xff] }
 0x378   : > { %v796_v14 = vpop.f32.mrf.mxu1 }
 0x379   : > { %v802_v15 = vadd.f32 %v796_v14, %v749_v13  ;;  %v1263_v14 = vld [vmem:[%s2056_s8] ss:$0 sm:$0xff] }
 0x37a   : > { %v1325_v16 = vpop.f32.mrf.mxu1 }
 0x37c   : > { %v799_v17 = vpop.f32.mrf.mxu1 }
 0x37e   : > { %v1326_v18 = vpop.f32.mrf.mxu1 }
 0x380   : > { %v853_v19 = vpop.f32.mrf.mxu1 }
 0x381   : > { %v859_v20 = vmul.f32 0.125, %v853_v19 }
 0x382   : > { %v1331_v21 = vpop.f32.mrf.mxu1 }
 0x383   : > { %v860_v22 = vsel %vm739_vm3, %v859_v20, -inf }
 0x384   : > { %861 = vmax.xlane.f32.xlu1 %v860_v22  ;;  %v856_v23 = vpop.f32.mrf.mxu1 }
 0x386   : > { %v1332_v24 = vpop.f32.mrf.mxu1 }
 0x388   : > { %751 = vadd.xlane.f32.xlu1 %v750_v26 }
 0x40d   : > { %v862_v27 = vpop.xlane.xlu1 %861 }
 0x40e   : > { %v866_v28 = vsub.f32 %v859_v20, %v862_v27  ;;  %v863_v42 = vsub.f32 -inf, %v862_v27 }
 0x410   : > { %v867_v29 = vmul.f32 1.442695, %v866_v28  ;;  %v864_v43 = vmul.f32 1.442695, %v863_v42 }
 0x411   : > { %v752_v30 = vpop.xlane.xlu1 %751 }
 0x412   : > { %v753_v31 = vadd.f32 %v752_v30, %v749_v13  ;;  %1507 = vpow2.f32 %v867_v29 }
 0x414   : > { %1509 = vrcp.f32 %v753_v31 }
 0x415   : > { %1511 = vpow2.f32 %v864_v43 }
 0x41f   : > { %v1508_v32 = vpop.eup %1507 }
 0x420   : > { %v870_v34 = vsel %vm739_vm3, %v1508_v32, 0.0  ;;  %v874_v35 = vpack.c.bf16 %v1508_v32, %v1508_v32 }
 0x421   : > { %v1510_v33 = vpop.eup %1509  ;;  %871 = vadd.xlane.f32.xlu0 %v870_v34 }
 0x422   : > { %v928_v36 = vmul.f32 %v1510_v33, %v802_v15  ;;  %1336 = vmatmul.mubr.msk.bf16.vlgmr.msra.gmra.mxu1 %vm739_vm3, %v874_v35  ;;  %v1512_v44 = vpop.eup %1511 }
 0x423   : > { %v869_v46 = vmul.f32 0.0, %v1512_v44 }
 0x4aa   : > { %v872_v45 = vpop.xlane.xlu0 %871 }
 0x4ab   : > { %v873_v47 = vadd.f32 %v872_v45, %v869_v46 }
 0x4ad   : > { %1513 = vrcp.f32 %v873_v47 }
 0x4ba   : > { %v1514_v53 = vpop.eup %1513 }
 0x4e2   : > { %v920_v51 = vpop.f32.mrf.mxu1 }
 0x4e3   : > { %v926_v52 = vadd.f32 %v920_v51, %v869_v46 }
 0x4e4   : > { %v1337_v54 = vpop.f32.mrf.mxu1 }
 0x4e5   : > { %v930_v55 = vmul.f32 %v1514_v53, %v926_v52 }
 0x4e6   : > { %v923_v56 = vpop.f32.mrf.mxu1 }
 0x4e7   : > { %932 = vrot.lane.b32.xlu1 %v930_v55, %s1724_s21  ;;  %s1725_s21 = smov [#allocation13]  }
 0x4e8   : > { %v1338_v57 = vpop.f32.mrf.mxu1  ;;  %s1627_s29 = sshll.u32 %s1725_s21, 4  ;;  %s1628_s29 = int_to_ptr.vmem [resolvable:$false] %s1627_s29 }
 0x4e9   : > { %s1629_s12 = scalar_lea.vmem %s1628_s29, 256  ;;  %p1630_p10 = scmp.lt.s32.totalorder %s1096_s28, %s1628_s29 }
 0x4ea   : > { %p1631_p5 = scmp.lt.s32.totalorder %s1629_s12, %s1623_s19 }
 0x4ec   : > { %p1632_p11 = por %p1631_p5, %p1630_p10 }
 0x4ee   : > { %p1633_p2 = pnand %p1632_p11, %p1626_p8 }
 0x559   : > { %v933_v58 = vpop.permute.xlu1 %932 }
 0x55a   : > { %v935_v59 = vsel %vm691_vm1, %v928_v36, %v933_v58 }
 0x55b   : > { %v936_v60 = vpack.c.bf16 %v935_v59, %v935_v59 }
 0x55d   : > { %937 = vst [vmem:[#allocation4] sm:$0xf] %v936_v60 }
 0x564   : > { %v938_v61 = vld [vmem:[#allocation4] sm:$0xf] }
 0x565   : > { %1356 = vmatmul.mubr.bf16.vlgmr.msra.gmra.mxu0 %v938_v61 }
 0x625   : > { %v1044_v62 = vpop.f32.mrf.mxu0 }
 0x626   : > { %v1045_v63 = vadd.f32 %v1253_v0, %v1044_v62 }
 0x627   : > { %v1357_v1 = vpop.f32.mrf.mxu0 }
 0x628   : > { %v1050_v2 = vadd.f32 %v1045_v63, %v1946_v25  ;;  %v1262_v25 = vld [vmem:[%s2055_s7] ss:$0 sm:$0xff] }
 0x629   : > { %v1047_v3 = vpop.f32.mrf.mxu0 }
 0x62a   : > { %1051 = vadd.xlane.f32.xlu0 %v1050_v2 }
 0x62b   : > { %v1358_v4 = vpop.f32.mrf.mxu0 }
 0x6b3   : > { %v1052_v5 = vpop.xlane.xlu0 %1051 }
 0x6b4   : > { %v1054_v6 = vmul.f32 0.0078125, %v1052_v5 }
 0x6b6   : > { %v1055_v7 = vsub.f32 %v1050_v2, %v1054_v6 }
 0x6b8   : > { %v1056_v8 = vmul.f32 %v1055_v7, %v1055_v7 }
 0x6ba   : > { %1057 = vadd.xlane.f32.xlu1 %v1056_v8 }
 0x743   : > { %v1058_v9 = vpop.xlane.xlu1 %1057 }
 0x744   : > { %v1059_v10 = vmul.f32 0.0078125, %v1058_v9 }
 0x746   : > { %v1060_v11 = vadd.f32 1e-12, %v1059_v10 }
 0x748   : > { %1515 = vrsqrt.f32 %v1060_v11 }
 0x755   : > { %v1516_v12 = vpop.eup %1515 }
 0x756   : > { %v1062_v13 = vmul.f32 %v1516_v12, %v1055_v7 }
 0x758   : > { %v1070_v15 = vmul.f32 %v1262_v25, %v1062_v13 }
 0x75a   : > { %v1078_v16 = vadd.f32 %v1263_v14, %v1070_v15 }
 0x75c   : > { %1079 = vst [vmem:[%s405_s15] sm:$0xff] %v1078_v16 }
 0x75d   : > { %1636 = shalt.err (!%p1633_p2)
}
 0x75e   : > { %s1637_s22 = scalar_lea.hbm %s1093_s5, 128  ;;  %s1641_s30 = scalar_lea.hbm %s2057_s9, 256 }
 0x75f   : > { %p1638_p7 = scmp.ne.s32.totalorder %s1093_s5, %s1637_s22  ;;  %p1642_p13 = scmp.lt.s32.totalorder %s1093_s5, %s2057_s9 }
 0x760   : > { %p1643_p0 = scmp.lt.s32.totalorder %s1641_s30, %s1637_s22 }
 0x761   : > { %p1639_p9 = pnand %p1638_p7, %p2080_p4 }
 0x762   : > { %p1644_p3 = por %p1643_p0, %p1642_p13 }
 0x763   : > { %p1640_p12 = pneg %p1639_p9 }
 0x765   : > { %p1645_p1 = pnand %p1644_p3, %p1640_p12 }
 0x767   : > { %1648 = shalt.err (!%p1645_p1)
}
 0x768   : > { %1373 = dma.vmem_to_hbm [thread:$0]  (%p2080_p4), %s1096_s28, 128, %s1093_s5, %s1081_s17  }
 0x769 PF: > { %s2081_s27 = sld [smem:[#allocation18_spill]]  ;;  %p2084_p8 = scmp.ge.s32.totalorder %s1711_s14, 2 }
 0x76a   : > { %s2082_s24 = sld [smem:[#allocation19_spill]] }
 0x76f   : > { %s1107_s15 = sand.u32 1, %s2081_s27  }
 0x770   : > { %p2083_p6 = scmp.ne.s32.totalorder %s2082_s24, 0  ;;  %s1108_s26 = scalar_lea.sflag [#allocation7], %s1107_s15 }
 0x772   : > { %p1390_p10 = pnand %p2084_p8, %p2083_p6 }
 0x774   : > { %p1391_p5 = pneg %p1390_p10 }
 0x776   : > { %1686 = dma.done.wait (%p1391_p5), %s1108_s26, 128  }
 0x777   : > { %1688 = vsyncadd (%p1391_p5), %s1108_s26, 4294967168  ;;  %s27_s14 = sadd.s32 1, %s1711_s14   ;;  %s2085_s25 = sld [smem:[#allocation20_spill]] }
 0x778   : > { %p24_p11 = scmp.ge.s32.totalorder %s27_s14, 4   ;;  %s2086_s30 = smov %s1695_s10 }
 0x779   : > { %s2087_s10 = smov %s1699_s11  ;;  %s2088_s11 = smov %s1897_s23 }
 0x77a   : > { %s2089_s12 = smov %s1707_s13  ;;  %26 = sbr.rel (!%p24_p11) target bundleno = 12 (0xc), region = 118 }
 0x77d   : > { %s2090_s13 = smov %s2085_s25 }
 0x77f   :  { %1113 = vsyncpa [#allocation6], 1 }
 0x780   :  { %1115 = vsyncpa [#allocation6 + $0x1], 1 }
 0x781   :  { %1116 = vsyncpa [#allocation9], 1 }
 0x782   :  { %1117 = vsyncpa [#allocation12], 1 }
 0x783   :  { %1118 = vsyncpa [#allocation7], 1 }
 0x784   :  { %1120 = vsyncpa [#allocation7 + $0x1], 1 }

</bundles_post_ra>
